<compile_context>
chip_gen: v6e
topology: v6e:2x2x1
jax: 0.10.0
libtpu: 0.0.40
codegen_flags: <defaults>
</compile_context>

<pallas_src>
import math
import numpy as np
import jax
import jax.numpy as jnp
from jax.experimental import pallas as pl
from jax.experimental.pallas import tpu as pltpu

BN_EPS = 1e-5


def _roll_by_residue(x3, residue_lane, max_shift, sign):
    """Per-lane joint-axis rotate of x3 (TM, V, X) by sign * residue_lane.

    residue_lane is a (1, 1, X) int32 tensor of shift amounts in [0, max_shift].
    Uses a binary (log-depth) decomposition: ceil(log2(max_shift+1)) static
    rolls + selects instead of one roll per distinct shift amount.
    """
    out = x3
    b = 1
    while b <= max_shift:
        out = jnp.where((residue_lane & b) != 0, jnp.roll(out, sign * b, axis=1), out)
        b <<= 1
    return out


def _shift_gcn_body(x_ref, fm_ref, w_ref, bnsc_ref, off_ref, o_ref, wd_ref):
    rows, C = x_ref.shape            # rows = tm * V
    V, D = bnsc_ref.shape
    TM = rows // V

    x = x_ref[...]                                   # (rows, C), compute dtype (bf16)
    xf = x.astype(jnp.float32).reshape(TM, V, C)     # f32 for the shift / mask math

    # ---- shift_in: xs[m, i, j] = x[m, (i + j % V) % V, j]
    jmod = jax.lax.broadcasted_iota(jnp.int32, (1, 1, C), 2) % V
    xs = _roll_by_residue(xf, jmod, min(C, V) - 1, -1)

    # ---- feature mask (tanh(M)+1 precomputed in the wrapper)
    xs = xs * fm_ref[...][None, :, :]

    # ---- pointwise linear on the MXU: (rows, C) @ (C, D), bf16 feed, f32 acc.
    # Linear bias is folded into the BN offset (off_ref), so no add here.
    y = jnp.dot(xs.reshape(rows, C).astype(x.dtype), w_ref[...],
                preferred_element_type=jnp.float32)
    y3 = y.reshape(TM, V, D)

    # ---- shift_out: ys[m, i, d] = y[m, (i - d % V) % V, d]
    dmod = jax.lax.broadcasted_iota(jnp.int32, (1, 1, D), 2) % V
    ys = _roll_by_residue(y3, dmod, min(D, V) - 1, +1)

    # ---- BatchNorm1d scale + (BN offset + Linear bias + down-path offset)
    z = ys * bnsc_ref[...][None, :, :] + off_ref[...][None, :, :]

    # ---- residual / "down" path. If in_ch == out_ch the residual is the raw
    # input (no matmul); otherwise it is x @ (Wd * dbn_scale) with the BN
    # offset already folded into off_ref.
    if wd_ref is None:
        r = x.astype(jnp.float32).reshape(TM, V, D)
    else:
        r = jnp.dot(x, wd_ref[...],
                    preferred_element_type=jnp.float32).reshape(TM, V, D)

    o_ref[...] = jnp.maximum(z + r, 0.0).reshape(rows, D)


def shift_gcn_kernel_down(x_ref, fm_ref, w_ref, wd_ref, bnsc_ref, off_ref, o_ref):
    _shift_gcn_body(x_ref, fm_ref, w_ref, bnsc_ref, off_ref, o_ref, wd_ref)


def shift_gcn_kernel_identity(x_ref, fm_ref, w_ref, bnsc_ref, off_ref, o_ref):
    _shift_gcn_body(x_ref, fm_ref, w_ref, bnsc_ref, off_ref, o_ref, None)


def _choose_tm(NT, V, C, D, x_bytes, budget_bytes=16 << 20, tm_cap=1024, min_grid=8):
    """Pick frames-per-tile from a VMEM budget (double-buffered blocks +
    f32 temporaries headroom), safe for v7x's 64 MiB VMEM, while keeping
    the grid >= min_grid steps for pipelining / megacore sharding."""
    per_row = V * (2 * C * x_bytes        # x block, double buffered
                   + 2 * D * 4            # out block, double buffered
                   + 4 * (C + D) * 4)     # in-kernel f32 temporaries headroom
    tm = int(max(1, min(tm_cap, budget_bytes // max(per_row, 1), NT)))
    if NT >= min_grid:
        tm = min(tm, max(1, NT // min_grid))
    # Largest divisor of NT that keeps the row-block a multiple of 8 sublanes.
    for t in range(tm, 0, -1):
        if NT % t == 0 and (t * V) % 8 == 0:
            return t
    for t in range(tm, 0, -1):
        if NT % t == 0:
            return t
    return NT


def shift_gcn_forward(x0, params, *, compute_dtype=jnp.bfloat16, tm=None,
                      vmem_limit_bytes=48 * 1024 * 1024):
    N, C, T, V = x0.shape
    D = params["W"].shape[1]
    NT = N * T

    # ---------------- constant parameter folding (runs once, outside kernel) --
    fm2 = (jnp.tanh(params["FM"]) + 1.0).reshape(V, C).astype(jnp.float32)

    inv_std = 1.0 / jnp.sqrt(params["bn_var"] + BN_EPS)
    bnsc = (params["bn_gamma"] * inv_std).reshape(V, D).astype(jnp.float32)
    bnof = (params["bn_beta"]
            - params["bn_mean"] * params["bn_gamma"] * inv_std).reshape(V, D)
    bias = params["bias"].reshape(D)

    has_down = params.get("Wd_conv", None) is not None
    if not has_down:                              # in_channels == out_channels
        assert C == D
        dof = jnp.zeros((D,), jnp.float32)
        wd = None
    else:
        dsc = params["dbn_gamma"] / jnp.sqrt(params["dbn_var"] + BN_EPS)
        wd_eff = params["Wd_conv"].T * dsc[None, :]                    # (C, D)
        dof = (params["bd"] - params["dbn_mean"]) * dsc + params["dbn_beta"]
        wd = wd_eff.astype(compute_dtype)

    # Linear bias (through shift_out) + down-path offset -> single (V, D) offset.
    off = (bnof + bias[None, :] * bnsc + dof[None, :]).astype(jnp.float32)

    w = params["W"].astype(compute_dtype)

    # (N, C, T, V) -> (N*T*V, C), lane axis = channels, bf16 to halve HBM bytes.
    x2 = jnp.transpose(x0, (0, 2, 3, 1)).reshape(NT * V, C).astype(compute_dtype)

    x_bytes = jnp.dtype(compute_dtype).itemsize
    if tm is None:
        tm = _choose_tm(NT, V, C, D, x_bytes)
    assert NT % tm == 0, (NT, tm)
    rows = tm * V
    assert rows % 8 == 0 or rows == NT * V, (rows,)

    in_specs = [
        pl.BlockSpec((rows, C), lambda i: (i, 0)),       # x rows
        pl.BlockSpec((V, C), lambda i: (0, 0)),          # tanh(FM)+1
        pl.BlockSpec((C, D), lambda i: (0, 0)),          # Linear_weight
    ]
    inputs = [x2, fm2, w]
    if has_down:
        in_specs.append(pl.BlockSpec((C, D), lambda i: (0, 0)))   # folded down weight
        inputs.append(wd)
    in_specs += [
        pl.BlockSpec((V, D), lambda i: (0, 0)),          # BN scale
        pl.BlockSpec((V, D), lambda i: (0, 0)),          # folded offset
    ]
    inputs += [bnsc, off]

    kernel = shift_gcn_kernel_down if has_down else shift_gcn_kernel_identity

    out = pl.pallas_call(
        kernel,
        out_shape=jax.ShapeDtypeStruct((NT * V, D), jnp.float32),
        grid_spec=pltpu.PrefetchScalarGridSpec(
            num_scalar_prefetch=0,
            grid=(NT // tm,),
            in_specs=in_specs,
            out_specs=pl.BlockSpec((rows, D), lambda i: (i, 0)),
        ),
        compiler_params=pltpu.CompilerParams(
            dimension_semantics=("parallel",),
            vmem_limit_bytes=vmem_limit_bytes,
        ),
    )(*inputs)

    return jnp.transpose(out.reshape(N, T, V, D), (0, 3, 1, 2))


def reference_forward(x0, params):
    """Pure-JAX (float32) mirror of the PyTorch forward (eval-mode BN)."""
    N, C, T, V = x0.shape
    D = params["W"].shape[1]
    shift_in = np.empty(V * C, dtype=np.int32)
    for i in range(V):
        for j in range(C):
            shift_in[i * C + j] = (i * C + j + j * C) % (C * V)
    shift_out = np.empty(V * D, dtype=np.int32)
    for i in range(V):
        for j in range(D):
            shift_out[i * D + j] = (i * D + j - j * D) % (D * V)

    x = jnp.transpose(x0, (0, 2, 3, 1)).reshape(N * T, V * C)
    x = x[:, shift_in]
    x = x.reshape(N * T, V, C)
    x = x * (jnp.tanh(params["FM"]) + 1.0)
    x = jnp.einsum("nwc,cd->nwd", x, params["W"])
    x = x + params["bias"]
    x = x.reshape(N * T, -1)
    x = x[:, shift_out]
    x = ((x - params["bn_mean"]) / jnp.sqrt(params["bn_var"] + BN_EPS)
         * params["bn_gamma"] + params["bn_beta"])
    x = jnp.transpose(x.reshape(N, T, V, D), (0, 3, 1, 2))

    if params.get("Wd_conv", None) is None:
        down = x0
    else:
        down = jnp.einsum("dc,nctv->ndtv", params["Wd_conv"], x0)
        down = down + params["bd"][None, :, None, None]
        down = ((down - params["dbn_mean"][None, :, None, None])
                / jnp.sqrt(params["dbn_var"] + BN_EPS)[None, :, None, None]
                * params["dbn_gamma"][None, :, None, None]
                + params["dbn_beta"][None, :, None, None])
    return jnp.maximum(x + down, 0.0)


def _make_params(key, C_in, C_out, V, with_down):
    ks = jax.random.split(key, 16)
    p = dict(
        W=jax.random.normal(ks[1], (C_in, C_out), jnp.float32) * math.sqrt(1.0 / C_out),
        bias=jax.random.normal(ks[2], (1, 1, C_out), jnp.float32) * 0.1,
        FM=jax.random.normal(ks[3], (1, V, C_in), jnp.float32) * 0.5,
        bn_gamma=1.0 + 0.1 * jax.random.normal(ks[4], (V * C_out,), jnp.float32),
        bn_beta=0.1 * jax.random.normal(ks[5], (V * C_out,), jnp.float32),
        bn_mean=0.1 * jax.random.normal(ks[6], (V * C_out,), jnp.float32),
        bn_var=jnp.abs(jax.random.normal(ks[7], (V * C_out,), jnp.float32)) + 0.5,
    )
    if with_down:
        p.update(
            Wd_conv=jax.random.normal(ks[8], (C_out, C_in), jnp.float32)
                    * math.sqrt(2.0 / C_out),
            bd=jnp.zeros((C_out,), jnp.float32),
            dbn_gamma=jnp.ones((C_out,), jnp.float32),
            dbn_beta=jnp.zeros((C_out,), jnp.float32),
            dbn_mean=0.1 * jax.random.normal(ks[9], (C_out,), jnp.float32),
            dbn_var=jnp.abs(jax.random.normal(ks[10], (C_out,), jnp.float32)) + 0.5,
        )
    else:
        p["Wd_conv"] = None
    return p


if __name__ == "__main__":
    key = jax.random.PRNGKey(0)
    k0, k1, k2, k3 = jax.random.split(key, 4)

    # --- case 1: in_channels != out_channels (conv + BN down path) ----------
    N, C_in, C_out, T, V = 4, 16, 32, 64, 8        # NT = 256 -> tm = 32, grid = 8
    x0 = jax.random.normal(k0, (N, C_in, T, V), jnp.float32)
    params = _make_params(k1, C_in, C_out, V, with_down=True)

    out = jax.block_until_ready(shift_gcn_forward(x0, params))
    ref = reference_forward(x0, params)
    assert out.shape == (N, C_out, T, V), out.shape
    err = float(jnp.max(jnp.abs(out - ref)))
    # bf16 MXU feeds vs. a float32 reference -> loose-ish absolute tolerance.
    assert err < 5e-2, f"max abs error too large (down path): {err}"

    # --- case 2: in_channels == out_channels (identity residual) ------------
    N2, C2, T2, V2 = 2, 16, 16, 8                  # NT = 32 -> tm = 4, grid = 8
    x1 = jax.random.normal(k2, (N2, C2, T2, V2), jnp.float32)
    params2 = _make_params(k3, C2, C2, V2, with_down=False)

    out2 = jax.block_until_ready(shift_gcn_forward(x1, params2))
    ref2 = reference_forward(x1, params2)
    assert out2.shape == (N2, C2, T2, V2), out2.shape
    err2 = float(jnp.max(jnp.abs(out2 - ref2)))
    assert err2 < 5e-2, f"max abs error too large (identity path): {err2}"

    print("KERNEL_OK")
</pallas_src>

<mosaic_0001>
module attributes {stable_mosaic.version = 11 : i64} {
  func.func @shift_gcn_kernel_down(%arg0: i32, %arg1: memref<256x16xbf16, #tpu.memory_space<vmem>>, %arg2: memref<8x16xf32, #tpu.memory_space<vmem>>, %arg3: memref<16x32xbf16, #tpu.memory_space<vmem>>, %arg4: memref<16x32xbf16, #tpu.memory_space<vmem>>, %arg5: memref<8x32xf32, #tpu.memory_space<vmem>>, %arg6: memref<8x32xf32, #tpu.memory_space<vmem>>, %arg7: memref<256x32xf32, #tpu.memory_space<vmem>>) attributes {dimension_semantics = [#tpu.dimension_semantics<parallel>], iteration_bounds = array<i64: 8>, scalar_prefetch = 0 : i64, scratch_operands = 0 : i64, tpu.core_type = #tpu.core_type<tc>, window_params = [{transform_indices = @transform_0, window_bounds = array<i64: 256, 16>}, {pipeline_mode = #tpu.pipeline_mode<synchronous>, transform_indices = @transform_1, window_bounds = array<i64: 8, 16>}, {pipeline_mode = #tpu.pipeline_mode<synchronous>, transform_indices = @transform_2, window_bounds = array<i64: 16, 32>}, {pipeline_mode = #tpu.pipeline_mode<synchronous>, transform_indices = @transform_3, window_bounds = array<i64: 16, 32>}, {pipeline_mode = #tpu.pipeline_mode<synchronous>, transform_indices = @transform_4, window_bounds = array<i64: 8, 32>}, {pipeline_mode = #tpu.pipeline_mode<synchronous>, transform_indices = @transform_5, window_bounds = array<i64: 8, 32>}, {transform_indices = @transform_6, window_bounds = array<i64: 256, 32>}]} {
    %c0 = arith.constant 0 : index
    %c0_0 = arith.constant 0 : index
    %0 = vector.load %arg1[%c0, %c0_0] : memref<256x16xbf16, #tpu.memory_space<vmem>>, vector<256x16xbf16>
    %1 = arith.extf %0 : vector<256x16xbf16> to vector<256x16xf32>
    %2 = vector.shape_cast %1 : vector<256x16xf32> to vector<32x8x16xf32>
    %3 = tpu.iota {dimensions = array<i32: 2>} : vector<1x1x16xi32>
    %c8_i32 = arith.constant 8 : i32
    %c0_i32 = arith.constant 0 : i32
    %4 = arith.cmpi eq, %c8_i32, %c0_i32 : i32
    %c1_i32 = arith.constant 1 : i32
    %5 = arith.select %4, %c1_i32, %c8_i32 : i32
    %6 = vector.broadcast %5 : i32 to vector<1x1x16xi32>
    %7 = arith.remsi %3, %6 : vector<1x1x16xi32>
    %c0_i32_1 = arith.constant 0 : i32
    %8 = vector.broadcast %c0_i32_1 : i32 to vector<1x1x16xi32>
    %9 = arith.cmpi ne, %7, %8 : vector<1x1x16xi32>
    %c0_i32_2 = arith.constant 0 : i32
    %10 = vector.broadcast %c0_i32_2 : i32 to vector<1x1x16xi32>
    %11 = arith.cmpi slt, %7, %10 : vector<1x1x16xi32>
    %c0_i32_3 = arith.constant 0 : i32
    %12 = arith.cmpi slt, %5, %c0_i32_3 : i32
    %13 = vector.broadcast %12 : i1 to vector<1x1x16xi1>
    %14 = vector.broadcast %13 : vector<1x1x16xi1> to vector<1x1x16xi1>
    %15 = arith.xori %11, %14 : vector<1x1x16xi1>
    %16 = arith.andi %15, %9 : vector<1x1x16xi1>
    %17 = vector.broadcast %5 : i32 to vector<1x1x16xi32>
    %18 = arith.addi %7, %17 : vector<1x1x16xi32>
    %19 = arith.select %16, %18, %7 : vector<1x1x16xi1>, vector<1x1x16xi32>
    %c1_i32_4 = arith.constant 1 : i32
    %20 = vector.broadcast %c1_i32_4 : i32 to vector<1x1x16xi32>
    %21 = arith.andi %19, %20 : vector<1x1x16xi32>
    %c0_i32_5 = arith.constant 0 : i32
    %22 = vector.broadcast %c0_i32_5 : i32 to vector<1x1x16xi32>
    %23 = arith.cmpi ne, %21, %22 : vector<1x1x16xi32>
    %24 = vector.extract_strided_slice %2 {offsets = [0, 1, 0], sizes = [32, 7, 16], strides = [1, 1, 1]} : vector<32x8x16xf32> to vector<32x7x16xf32>
    %25 = vector.extract_strided_slice %2 {offsets = [0, 0, 0], sizes = [32, 1, 16], strides = [1, 1, 1]} : vector<32x8x16xf32> to vector<32x1x16xf32>
    %26 = tpu.concatenate %24, %25 in 1 : vector<32x7x16xf32>, vector<32x1x16xf32> -> vector<32x8x16xf32>
    %27 = vector.shape_cast %23 : vector<1x1x16xi1> to vector<1x1x16xi1>
    %28 = vector.broadcast %27 : vector<1x1x16xi1> to vector<32x8x16xi1>
    %29 = arith.select %28, %26, %2 : vector<32x8x16xi1>, vector<32x8x16xf32>
    %c2_i32 = arith.constant 2 : i32
    %30 = vector.broadcast %c2_i32 : i32 to vector<1x1x16xi32>
    %31 = arith.andi %19, %30 : vector<1x1x16xi32>
    %c0_i32_6 = arith.constant 0 : i32
    %32 = vector.broadcast %c0_i32_6 : i32 to vector<1x1x16xi32>
    %33 = arith.cmpi ne, %31, %32 : vector<1x1x16xi32>
    %34 = vector.extract_strided_slice %29 {offsets = [0, 2, 0], sizes = [32, 6, 16], strides = [1, 1, 1]} : vector<32x8x16xf32> to vector<32x6x16xf32>
    %35 = vector.extract_strided_slice %29 {offsets = [0, 0, 0], sizes = [32, 2, 16], strides = [1, 1, 1]} : vector<32x8x16xf32> to vector<32x2x16xf32>
    %36 = tpu.concatenate %34, %35 in 1 : vector<32x6x16xf32>, vector<32x2x16xf32> -> vector<32x8x16xf32>
    %37 = vector.shape_cast %33 : vector<1x1x16xi1> to vector<1x1x16xi1>
    %38 = vector.broadcast %37 : vector<1x1x16xi1> to vector<32x8x16xi1>
    %39 = arith.select %38, %36, %29 : vector<32x8x16xi1>, vector<32x8x16xf32>
    %c4_i32 = arith.constant 4 : i32
    %40 = vector.broadcast %c4_i32 : i32 to vector<1x1x16xi32>
    %41 = arith.andi %19, %40 : vector<1x1x16xi32>
    %c0_i32_7 = arith.constant 0 : i32
    %42 = vector.broadcast %c0_i32_7 : i32 to vector<1x1x16xi32>
    %43 = arith.cmpi ne, %41, %42 : vector<1x1x16xi32>
    %44 = vector.extract_strided_slice %39 {offsets = [0, 4, 0], sizes = [32, 4, 16], strides = [1, 1, 1]} : vector<32x8x16xf32> to vector<32x4x16xf32>
    %45 = vector.extract_strided_slice %39 {offsets = [0, 0, 0], sizes = [32, 4, 16], strides = [1, 1, 1]} : vector<32x8x16xf32> to vector<32x4x16xf32>
    %46 = tpu.concatenate %44, %45 in 1 : vector<32x4x16xf32>, vector<32x4x16xf32> -> vector<32x8x16xf32>
    %47 = vector.shape_cast %43 : vector<1x1x16xi1> to vector<1x1x16xi1>
    %48 = vector.broadcast %47 : vector<1x1x16xi1> to vector<32x8x16xi1>
    %49 = arith.select %48, %46, %39 : vector<32x8x16xi1>, vector<32x8x16xf32>
    %c0_8 = arith.constant 0 : index
    %c0_9 = arith.constant 0 : index
    %50 = vector.load %arg2[%c0_8, %c0_9] : memref<8x16xf32, #tpu.memory_space<vmem>>, vector<8x16xf32>
    %51 = vector.shape_cast %50 : vector<8x16xf32> to vector<1x8x16xf32>
    %52 = vector.broadcast %51 : vector<1x8x16xf32> to vector<32x8x16xf32>
    %53 = arith.mulf %49, %52 : vector<32x8x16xf32>
    %54 = vector.shape_cast %53 : vector<32x8x16xf32> to vector<256x16xf32>
    %55 = arith.truncf %54 : vector<256x16xf32> to vector<256x16xbf16>
    %c0_10 = arith.constant 0 : index
    %c0_11 = arith.constant 0 : index
    %56 = vector.load %arg3[%c0_10, %c0_11] : memref<16x32xbf16, #tpu.memory_space<vmem>>, vector<16x32xbf16>
    %cst = arith.constant dense<0.000000e+00> : vector<256x32xf32>
    %57 = tpu.matmul %55, %56, %cst {dimension_numbers = #tpu.dot_dimension_numbers<[1], [0], [0], [1], [0, 0, 1, 1], [], []>} : vector<256x16xbf16>, vector<16x32xbf16>, vector<256x32xf32> -> vector<256x32xf32>
    %58 = vector.shape_cast %57 : vector<256x32xf32> to vector<32x8x32xf32>
    %59 = tpu.iota {dimensions = array<i32: 2>} : vector<1x1x32xi32>
    %c8_i32_12 = arith.constant 8 : i32
    %c0_i32_13 = arith.constant 0 : i32
    %60 = arith.cmpi eq, %c8_i32_12, %c0_i32_13 : i32
    %c1_i32_14 = arith.constant 1 : i32
    %61 = arith.select %60, %c1_i32_14, %c8_i32_12 : i32
    %62 = vector.broadcast %61 : i32 to vector<1x1x32xi32>
    %63 = arith.remsi %59, %62 : vector<1x1x32xi32>
    %c0_i32_15 = arith.constant 0 : i32
    %64 = vector.broadcast %c0_i32_15 : i32 to vector<1x1x32xi32>
    %65 = arith.cmpi ne, %63, %64 : vector<1x1x32xi32>
    %c0_i32_16 = arith.constant 0 : i32
    %66 = vector.broadcast %c0_i32_16 : i32 to vector<1x1x32xi32>
    %67 = arith.cmpi slt, %63, %66 : vector<1x1x32xi32>
    %c0_i32_17 = arith.constant 0 : i32
    %68 = arith.cmpi slt, %61, %c0_i32_17 : i32
    %69 = vector.broadcast %68 : i1 to vector<1x1x32xi1>
    %70 = vector.broadcast %69 : vector<1x1x32xi1> to vector<1x1x32xi1>
    %71 = arith.xori %67, %70 : vector<1x1x32xi1>
    %72 = arith.andi %71, %65 : vector<1x1x32xi1>
    %73 = vector.broadcast %61 : i32 to vector<1x1x32xi32>
    %74 = arith.addi %63, %73 : vector<1x1x32xi32>
    %75 = arith.select %72, %74, %63 : vector<1x1x32xi1>, vector<1x1x32xi32>
    %c1_i32_18 = arith.constant 1 : i32
    %76 = vector.broadcast %c1_i32_18 : i32 to vector<1x1x32xi32>
    %77 = arith.andi %75, %76 : vector<1x1x32xi32>
    %c0_i32_19 = arith.constant 0 : i32
    %78 = vector.broadcast %c0_i32_19 : i32 to vector<1x1x32xi32>
    %79 = arith.cmpi ne, %77, %78 : vector<1x1x32xi32>
    %80 = vector.extract_strided_slice %58 {offsets = [0, 7, 0], sizes = [32, 1, 32], strides = [1, 1, 1]} : vector<32x8x32xf32> to vector<32x1x32xf32>
    %81 = vector.extract_strided_slice %58 {offsets = [0, 0, 0], sizes = [32, 7, 32], strides = [1, 1, 1]} : vector<32x8x32xf32> to vector<32x7x32xf32>
    %82 = tpu.concatenate %80, %81 in 1 : vector<32x1x32xf32>, vector<32x7x32xf32> -> vector<32x8x32xf32>
    %83 = vector.shape_cast %79 : vector<1x1x32xi1> to vector<1x1x32xi1>
    %84 = vector.broadcast %83 : vector<1x1x32xi1> to vector<32x8x32xi1>
    %85 = arith.select %84, %82, %58 : vector<32x8x32xi1>, vector<32x8x32xf32>
    %c2_i32_20 = arith.constant 2 : i32
    %86 = vector.broadcast %c2_i32_20 : i32 to vector<1x1x32xi32>
    %87 = arith.andi %75, %86 : vector<1x1x32xi32>
    %c0_i32_21 = arith.constant 0 : i32
    %88 = vector.broadcast %c0_i32_21 : i32 to vector<1x1x32xi32>
    %89 = arith.cmpi ne, %87, %88 : vector<1x1x32xi32>
    %90 = vector.extract_strided_slice %85 {offsets = [0, 6, 0], sizes = [32, 2, 32], strides = [1, 1, 1]} : vector<32x8x32xf32> to vector<32x2x32xf32>
    %91 = vector.extract_strided_slice %85 {offsets = [0, 0, 0], sizes = [32, 6, 32], strides = [1, 1, 1]} : vector<32x8x32xf32> to vector<32x6x32xf32>
    %92 = tpu.concatenate %90, %91 in 1 : vector<32x2x32xf32>, vector<32x6x32xf32> -> vector<32x8x32xf32>
    %93 = vector.shape_cast %89 : vector<1x1x32xi1> to vector<1x1x32xi1>
    %94 = vector.broadcast %93 : vector<1x1x32xi1> to vector<32x8x32xi1>
    %95 = arith.select %94, %92, %85 : vector<32x8x32xi1>, vector<32x8x32xf32>
    %c4_i32_22 = arith.constant 4 : i32
    %96 = vector.broadcast %c4_i32_22 : i32 to vector<1x1x32xi32>
    %97 = arith.andi %75, %96 : vector<1x1x32xi32>
    %c0_i32_23 = arith.constant 0 : i32
    %98 = vector.broadcast %c0_i32_23 : i32 to vector<1x1x32xi32>
    %99 = arith.cmpi ne, %97, %98 : vector<1x1x32xi32>
    %100 = vector.extract_strided_slice %95 {offsets = [0, 4, 0], sizes = [32, 4, 32], strides = [1, 1, 1]} : vector<32x8x32xf32> to vector<32x4x32xf32>
    %101 = vector.extract_strided_slice %95 {offsets = [0, 0, 0], sizes = [32, 4, 32], strides = [1, 1, 1]} : vector<32x8x32xf32> to vector<32x4x32xf32>
    %102 = tpu.concatenate %100, %101 in 1 : vector<32x4x32xf32>, vector<32x4x32xf32> -> vector<32x8x32xf32>
    %103 = vector.shape_cast %99 : vector<1x1x32xi1> to vector<1x1x32xi1>
    %104 = vector.broadcast %103 : vector<1x1x32xi1> to vector<32x8x32xi1>
    %105 = arith.select %104, %102, %95 : vector<32x8x32xi1>, vector<32x8x32xf32>
    %c0_24 = arith.constant 0 : index
    %c0_25 = arith.constant 0 : index
    %106 = vector.load %arg5[%c0_24, %c0_25] : memref<8x32xf32, #tpu.memory_space<vmem>>, vector<8x32xf32>
    %107 = vector.shape_cast %106 : vector<8x32xf32> to vector<1x8x32xf32>
    %108 = vector.broadcast %107 : vector<1x8x32xf32> to vector<32x8x32xf32>
    %109 = arith.mulf %105, %108 : vector<32x8x32xf32>
    %c0_26 = arith.constant 0 : index
    %c0_27 = arith.constant 0 : index
    %110 = vector.load %arg6[%c0_26, %c0_27] : memref<8x32xf32, #tpu.memory_space<vmem>>, vector<8x32xf32>
    %111 = vector.shape_cast %110 : vector<8x32xf32> to vector<1x8x32xf32>
    %112 = vector.broadcast %111 : vector<1x8x32xf32> to vector<32x8x32xf32>
    %113 = arith.addf %109, %112 : vector<32x8x32xf32>
    %c0_28 = arith.constant 0 : index
    %c0_29 = arith.constant 0 : index
    %114 = vector.load %arg4[%c0_28, %c0_29] : memref<16x32xbf16, #tpu.memory_space<vmem>>, vector<16x32xbf16>
    %cst_30 = arith.constant dense<0.000000e+00> : vector<256x32xf32>
    %115 = tpu.matmul %0, %114, %cst_30 {dimension_numbers = #tpu.dot_dimension_numbers<[1], [0], [0], [1], [0, 0, 1, 1], [], []>} : vector<256x16xbf16>, vector<16x32xbf16>, vector<256x32xf32> -> vector<256x32xf32>
    %116 = vector.shape_cast %115 : vector<256x32xf32> to vector<32x8x32xf32>
    %117 = arith.addf %113, %116 : vector<32x8x32xf32>
    %cst_31 = arith.constant 0.000000e+00 : f32
    %118 = vector.broadcast %cst_31 : f32 to vector<32x8x32xf32>
    %119 = arith.maximumf %117, %118 : vector<32x8x32xf32>
    %120 = vector.shape_cast %119 : vector<32x8x32xf32> to vector<256x32xf32>
    %c0_32 = arith.constant 0 : index
    %c0_33 = arith.constant 0 : index
    %121 = vector.load %arg7[%c0_32, %c0_33] : memref<256x32xf32, #tpu.memory_space<vmem>>, vector<256x32xf32>
    tpu.vector_store %arg7[%c0_32, %c0_33], %120 {strides = array<i32>} : memref<256x32xf32, #tpu.memory_space<vmem>>, vector<256x32xf32>,
    return
  }
  func.func @transform_0(%arg0: i32) -> (i32, i32) {
    %c0_i32 = arith.constant 0 : i32
    %c0_i32_0 = arith.constant 0 : i32
    return %arg0, %c0_i32 : i32, i32
  }
  func.func @transform_1(%arg0: i32) -> (i32, i32) {
    %c0_i32 = arith.constant 0 : i32
    %c0_i32_0 = arith.constant 0 : i32
    %c0_i32_1 = arith.constant 0 : i32
    return %c0_i32, %c0_i32_0 : i32, i32
  }
  func.func @transform_2(%arg0: i32) -> (i32, i32) {
    %c0_i32 = arith.constant 0 : i32
    %c0_i32_0 = arith.constant 0 : i32
    %c0_i32_1 = arith.constant 0 : i32
    return %c0_i32, %c0_i32_0 : i32, i32
  }
  func.func @transform_3(%arg0: i32) -> (i32, i32) {
    %c0_i32 = arith.constant 0 : i32
    %c0_i32_0 = arith.constant 0 : i32
    %c0_i32_1 = arith.constant 0 : i32
    return %c0_i32, %c0_i32_0 : i32, i32
  }
  func.func @transform_4(%arg0: i32) -> (i32, i32) {
    %c0_i32 = arith.constant 0 : i32
    %c0_i32_0 = arith.constant 0 : i32
    %c0_i32_1 = arith.constant 0 : i32
    return %c0_i32, %c0_i32_0 : i32, i32
  }
  func.func @transform_5(%arg0: i32) -> (i32, i32) {
    %c0_i32 = arith.constant 0 : i32
    %c0_i32_0 = arith.constant 0 : i32
    %c0_i32_1 = arith.constant 0 : i32
    return %c0_i32, %c0_i32_0 : i32, i32
  }
  func.func @transform_6(%arg0: i32) -> (i32, i32) {
    %c0_i32 = arith.constant 0 : i32
    %c0_i32_0 = arith.constant 0 : i32
    return %arg0, %c0_i32 : i32, i32
  }
}

</mosaic_0001>

<bundles_post_ra>
// kernel: tpu_custom_call.1
= control target key start
LH: loop header
LB: loop body
LE: loop exit
PB: predicated region body
PF: predicated region fallthrough
CT: control target
= control target key end

     0   :  { %s2342_s21 = smov 0   ;;  %s3096_s0 = inlined_call_operand.vmem [shape: bf16[2048,16], index: 0, kind: input, shape index: {}]   ;;  %s3097_s1 = inlined_call_operand.vmem [shape: f32[8,16], index: 1, kind: input, shape index: {}]   ;;  %s3098_s2 = inlined_call_operand.vmem [shape: bf16[16,32], index: 2, kind: input, shape index: {}]   ;;  %s3099_s3 = inlined_call_operand.vmem [shape: bf16[16,32], index: 3, kind: input, shape index: {}]   ;;  %s3100_s4 = inlined_call_operand.vmem [shape: f32[8,32], index: 4, kind: input, shape index: {}]   ;;  %s3101_s5 = inlined_call_operand.vmem [shape: f32[8,32], index: 5, kind: input, shape index: {}]   ;;  %s3102_s6 = inlined_call_operand.vmem [shape: f32[2048,32], index: 6, kind: output, shape index: {}]  }
   0x1 LB: > { %s2094_s22 = sadd.s32 4294967295, %s2305_s21   ;;  %p2098_p0 = scmp.ge.s32.totalorder %s2305_s21, 1  ;;  %s2305_s21 = sphi %s2342_s21, %s16_s21  }
   0x2   : > { %p213_p1 = scmp.lt.s32.totalorder %s2305_s21, 9 }
   0x4   : > { %p214_p2 = pnand %p2098_p0, %p213_p1 }
   0x5   : > { %s2099_s25 = sshll.u32 (!%p214_p2), %s2094_s22, 5 }
   0x6   : > { %217 = sbr.rel (%p214_p2) target bundleno = 320 (0x140), region = 44  ;;  %p244_p3 = scmp.lt.s32.totalorder (!%p214_p2), %s2099_s25, 255 }
   0xb   : > { %v2265_v0 = vld [vmem:[%s3098_s2] sm:$0xff]   ;;  %v320_v1 = vlaneseq  ;;  %s3110_s25 = smov (!%p244_p3, %s2099_s25), 255  ;;  %vm886_vm0 = vcmask 130048   ;;  %vm2005_vm4 = vcmask 261120  }
   0xc   : > { %v2266_v2 = vld [vmem:[%s3099_s3] sm:$0xff]   ;;  %2189 = vmatprep.subr.bf16.mxu0 %v2265_v0  ;;  %s2100_s28 = sshll.u32 %s3110_s25, 2  ;;  %s2102_s14 = sshll.u32 %s3110_s25, 3 }
   0xd   : > { %v321_v3 = vand.u32 127, %v320_v1  ;;  %2190 = vmatpush3.bf16.msra.mxu0 %v2265_v0  ;;  %2223 = vmatprep.subr.bf16.mxu1 %v2266_v2  ;;  %s2362_s7 = scalar_lea.vmem %s3096_s0, %s2100_s28  ;;  %v2408_v44 = vld [vmem:[%s3097_s1] sm:$0xff]  ;;  %s2743_s17 = scalar_lea.vmem %s3102_s6, %s2102_s14 }
   0xe   : > { %2224 = vmatpush3.bf16.msra.mxu1 %v2266_v2  ;;  %v256_v8 = vld [vmem:[%s2362_s7] sm:$0xff]   ;;  %v258_v9 = vld [vmem:[%s2362_s7 + $0x8] sm:$0xff]   ;;  %v2367_v10 = vld [vmem:[%s2362_s7 + $0x10] sm:$0xff]  }
   0xf   : > { %v326_v4 = vand.u32 7, %v321_v3  ;;  %v288_v11 = vunpack.c.l.bf16 %v256_v8  ;;  %v289_v12 = vunpack.c.h.bf16 %v256_v8  ;;  %v2378_v15 = vld [vmem:[%s2362_s7 + $0x18] sm:$0xff]   ;;  %v290_v17 = vunpack.c.l.bf16 %v258_v9  ;;  %2225 = vmatprep.mubr.msk.bf16.mxu1 %vm886_vm0, %v256_v8  ;;  %v264_v59 = vld [vmem:[%s2362_s7 + $0x20] sm:$0xff]  }
  0x10   : > { %v291_v18 = vunpack.c.h.bf16 %v258_v9  ;;  %v292_v21 = vunpack.c.l.bf16 %v2367_v10  ;;  %v293_v22 = vunpack.c.h.bf16 %v2367_v10  ;;  %v294_v25 = vunpack.c.l.bf16 %v2378_v15 }
  0x11   : > { %v334_v5 = vand.u32 1, %v326_v4  ;;  %v499_v6 = vand.u32 2, %v326_v4  ;;  %v664_v7 = vand.u32 4, %v326_v4  ;;  %v368_v19 = vrot.slane %v288_v11, 1  ;;  %2226 = vmatmul.mubr.msk.bf16.vlgmr.msra.gmra.mxu1 %vm886_vm0, %v258_v9  ;;  %v2439_v4 = vld [vmem:[%s2362_s7 + $0x28] sm:$0xff]  }
  0x12   : > { %v369_v20 = vrot.slane %v289_v12, 1  ;;  %v370_v23 = vrot.slane %v290_v17, 1  ;;  %v371_v24 = vrot.slane %v291_v18, 1  ;;  %v372_v28 = vrot.slane %v292_v21, 1  ;;  %2229 = vmatprep.mubr.msk.bf16.mxu1 %vm886_vm0, %v2367_v10 }
  0x13   : > { %vm2369_vm1 = vcmp.ne.s32.totalorder %v334_v5, 0  ;;  %vm2373_vm2 = vcmp.ne.s32.totalorder %v499_v6, 0  ;;  %vm2380_vm3 = vcmp.ne.s32.totalorder %v664_v7, 0  ;;  %v373_v29 = vrot.slane %v293_v22, 1 }
  0x14   : > { %v467_v26 = vsel %vm2369_vm1, %v368_v19, %v288_v11  ;;  %v468_v27 = vsel %vm2369_vm1, %v369_v20, %v289_v12  ;;  %v469_v32 = vsel %vm2369_vm1, %v370_v23, %v290_v17  ;;  %v470_v33 = vsel %vm2369_vm1, %v371_v24, %v291_v18  ;;  %v2450_v20 = vld [vmem:[%s2362_s7 + $0x30] sm:$0xff]  }
  0x15   : > { %v533_v30 = vrot.slane %v467_v26, 2  ;;  %v534_v31 = vrot.slane %v468_v27, 2  ;;  %v535_v34 = vrot.slane %v469_v32, 2  ;;  %v536_v35 = vrot.slane %v470_v33, 2 }
  0x16   : > { %v471_v36 = vsel %vm2369_vm1, %v372_v28, %v292_v21  ;;  %v472_v37 = vsel %vm2369_vm1, %v373_v29, %v293_v22  ;;  %v295_v3 = vunpack.c.h.bf16 %v2378_v15  ;;  %v374_v6 = vrot.slane %v294_v25, 1 }
  0x17   : > { %v632_v38 = vsel %vm2373_vm2, %v533_v30, %v467_v26  ;;  %v633_v39 = vsel %vm2373_vm2, %v534_v31, %v468_v27  ;;  %v537_v40 = vrot.slane %v471_v36, 2  ;;  %v538_v41 = vrot.slane %v472_v37, 2 }
  0x18   : > { %v698_v42 = vrot.slane %v632_v38, 4  ;;  %v699_v43 = vrot.slane %v633_v39, 4  ;;  %v634_v45 = vsel %vm2373_vm2, %v535_v34, %v469_v32  ;;  %v635_v46 = vsel %vm2373_vm2, %v536_v35, %v470_v33 }
  0x19   : > { %v700_v47 = vrot.slane %v634_v45, 4  ;;  %v701_v48 = vrot.slane %v635_v46, 4  ;;  %v636_v49 = vsel %vm2373_vm2, %v537_v40, %v471_v36  ;;  %v637_v50 = vsel %vm2373_vm2, %v538_v41, %v472_v37  ;;  %2230 = vmatmul.mubr.msk.bf16.gmra.mxu1 %vm886_vm0, %v2378_v15 }
  0x1a   : > { %v797_v51 = vsel %vm2380_vm3, %v698_v42, %v632_v38  ;;  %v798_v52 = vsel %vm2380_vm3, %v699_v43, %v633_v39  ;;  %v702_v53 = vrot.slane %v636_v49, 4  ;;  %v703_v54 = vrot.slane %v637_v50, 4  ;;  %2233 = vmatprep.mubr.msk.bf16.mxu1 %vm886_vm0, %v264_v59 }
  0x1b   : > { %v830_v55 = vmul.f32 %v2408_v44, %v797_v51  ;;  %v831_v56 = vmul.f32 %v2408_v44, %v798_v52  ;;  %v799_v57 = vsel %vm2380_vm3, %v700_v47, %v634_v45  ;;  %v800_v58 = vsel %vm2380_vm3, %v701_v48, %v635_v46 }
  0x1c   : > { %v832_v60 = vmul.f32 %v2408_v44, %v799_v57  ;;  %v833_v61 = vmul.f32 %v2408_v44, %v800_v58  ;;  %v801_v62 = vsel %vm2380_vm3, %v702_v53, %v636_v49  ;;  %v802_v63 = vsel %vm2380_vm3, %v703_v54, %v637_v50 }
  0x1d   : > { %v862_v0 = vpack.c.bf16 %v831_v56, %v830_v55  ;;  %v834_v1 = vmul.f32 %v2408_v44, %v801_v62  ;;  %v835_v2 = vmul.f32 %v2408_v44, %v802_v63  ;;  %v296_v7 = vunpack.c.l.bf16 %v264_v59  ;;  %v270_v55 = vld [vmem:[%s2362_s7 + $0x38] sm:$0xff]   ;;  %v272_v63 = vld [vmem:[%s2362_s7 + $0x40] sm:$0xff]  }
  0x1e   : > { %v863_v5 = vpack.c.bf16 %v833_v61, %v832_v60  ;;  %v375_v9 = vrot.slane %v295_v3, 1  ;;  %v297_v11 = vunpack.c.h.bf16 %v264_v59  ;;  %v473_v12 = vsel %vm2369_vm1, %v374_v6, %v294_v25 }
  0x1f   : > { %2191 = vmatprep.mubr.msk.bf16.mxu0 %vm886_vm0, %v862_v0  ;;  %v864_v8 = vpack.c.bf16 %v835_v2, %v834_v1  ;;  %v376_v17 = vrot.slane %v296_v7, 1  ;;  %v298_v18 = vunpack.c.l.bf16 %v2439_v4  ;;  %v299_v19 = vunpack.c.h.bf16 %v2439_v4 }
  0x20   : > { %2192 = vmatmul.mubr.msk.bf16.vlgmr.msra.gmra.mxu0 %vm886_vm0, %v863_v5  ;;  %v474_v21 = vsel %vm2369_vm1, %v375_v9, %v295_v3  ;;  %v539_v22 = vrot.slane %v473_v12, 2  ;;  %v377_v23 = vrot.slane %v297_v11, 1  ;;  %v300_v30 = vunpack.c.l.bf16 %v2450_v20 }
  0x21   : > { %2195 = vmatprep.mubr.msk.bf16.mxu0 %vm886_vm0, %v864_v8  ;;  %v540_v24 = vrot.slane %v474_v21, 2  ;;  %v475_v10 = vsel %vm2369_vm1, %v376_v17, %v296_v7  ;;  %v378_v25 = vrot.slane %v298_v18, 1  ;;  %v379_v26 = vrot.slane %v299_v19, 1  ;;  %2234 = vmatmul.mubr.msk.bf16.gmra.mxu1 %vm886_vm0, %v2439_v4 }
  0x22   : > { %v638_v27 = vsel %vm2373_vm2, %v539_v22, %v473_v12  ;;  %v476_v28 = vsel %vm2369_vm1, %v377_v23, %v297_v11  ;;  %v541_v29 = vrot.slane %v475_v10, 2  ;;  %v301_v54 = vunpack.c.h.bf16 %v2450_v20  ;;  %2237 = vmatprep.mubr.msk.bf16.mxu1 %vm886_vm0, %v2450_v20 }
  0x23   : > { %v639_v15 = vsel %vm2373_vm2, %v540_v24, %v474_v21  ;;  %v704_v31 = vrot.slane %v638_v27, 4  ;;  %v542_v32 = vrot.slane %v476_v28, 2  ;;  %v477_v33 = vsel %vm2369_vm1, %v378_v25, %v298_v18  ;;  %v2513_v21 = vld [vmem:[%s2362_s7 + $0x48] sm:$0xff]  }
  0x24   : > { %v705_v34 = vrot.slane %v639_v15, 4  ;;  %v640_v35 = vsel %vm2373_vm2, %v541_v29, %v475_v10  ;;  %v478_v36 = vsel %vm2369_vm1, %v379_v26, %v299_v19  ;;  %v543_v37 = vrot.slane %v477_v33, 2 }
  0x25   : > { %v803_v38 = vsel %vm2380_vm3, %v704_v31, %v638_v27  ;;  %v641_v39 = vsel %vm2373_vm2, %v542_v32, %v476_v28  ;;  %v706_v40 = vrot.slane %v640_v35, 4  ;;  %v544_v41 = vrot.slane %v478_v36, 2 }
  0x26   : > { %v804_v42 = vsel %vm2380_vm3, %v705_v34, %v639_v15  ;;  %v836_v43 = vmul.f32 %v2408_v44, %v803_v38  ;;  %v707_v45 = vrot.slane %v641_v39, 4  ;;  %v642_v46 = vsel %vm2373_vm2, %v543_v37, %v477_v33 }
  0x27   : > { %v837_v47 = vmul.f32 %v2408_v44, %v804_v42  ;;  %v805_v48 = vsel %vm2380_vm3, %v706_v40, %v640_v35  ;;  %v643_v49 = vsel %vm2373_vm2, %v544_v41, %v478_v36  ;;  %v708_v50 = vrot.slane %v642_v46, 4 }
  0x28   : > { %v806_v51 = vsel %vm2380_vm3, %v707_v45, %v641_v39  ;;  %v838_v52 = vmul.f32 %v2408_v44, %v805_v48  ;;  %v709_v53 = vrot.slane %v643_v49, 4  ;;  %v380_v59 = vrot.slane %v300_v30, 1 }
  0x29   : > { %v865_v56 = vpack.c.bf16 %v837_v47, %v836_v43  ;;  %v839_v57 = vmul.f32 %v2408_v44, %v806_v51  ;;  %v807_v58 = vsel %vm2380_vm3, %v708_v50, %v642_v46  ;;  %v381_v62 = vrot.slane %v301_v54, 1  ;;  %2238 = vmatmul.mubr.msk.bf16.gmra.mxu1 %vm886_vm0, %v270_v55  ;;  %v276_v46 = vld [vmem:[%s2362_s7 + $0x50] sm:$0xff]  }
  0x2a   : > { %v808_v60 = vsel %vm2380_vm3, %v709_v53, %v643_v49  ;;  %v840_v61 = vmul.f32 %v2408_v44, %v807_v58  ;;  %v479_v2 = vsel %vm2369_vm1, %v380_v59, %v300_v30  ;;  %v302_v3 = vunpack.c.l.bf16 %v270_v55  ;;  %2241 = vmatprep.mubr.msk.bf16.mxu1 %vm886_vm0, %v272_v63  ;;  %v2557_v59 = vld [vmem:[%s2362_s7 + $0x58] sm:$0xff]  }
  0x2b   : > { %2196 = vmatmul.mubr.msk.bf16.gmra.mxu0 %vm886_vm0, %v865_v56  ;;  %v866_v0 = vpack.c.bf16 %v839_v57, %v838_v52  ;;  %v841_v1 = vmul.f32 %v2408_v44, %v808_v60  ;;  %v480_v5 = vsel %vm2369_vm1, %v381_v62, %v301_v54  ;;  %v545_v6 = vrot.slane %v479_v2, 2 }
  0x2c   : > { %v303_v7 = vunpack.c.h.bf16 %v270_v55  ;;  %v546_v9 = vrot.slane %v480_v5, 2  ;;  %v382_v11 = vrot.slane %v302_v3, 1  ;;  %v304_v12 = vunpack.c.l.bf16 %v272_v63 }
  0x2d   : > { %2199 = vmatprep.mubr.msk.bf16.mxu0 %vm886_vm0, %v866_v0  ;;  %v867_v8 = vpack.c.bf16 %v841_v1, %v840_v61  ;;  %v644_v17 = vsel %vm2373_vm2, %v545_v6, %v479_v2  ;;  %v305_v19 = vunpack.c.h.bf16 %v272_v63  ;;  %v306_v30 = vunpack.c.l.bf16 %v2513_v21 }
  0x2e   : > { %v383_v18 = vrot.slane %v303_v7, 1  ;;  %v645_v4 = vsel %vm2373_vm2, %v546_v9, %v480_v5  ;;  %v710_v22 = vrot.slane %v644_v17, 4  ;;  %v481_v23 = vsel %vm2369_vm1, %v382_v11, %v302_v3 }
  0x2f   : > { %v384_v24 = vrot.slane %v304_v12, 1  ;;  %v711_v10 = vrot.slane %v645_v4, 4  ;;  %v547_v26 = vrot.slane %v481_v23, 2  ;;  %v385_v27 = vrot.slane %v305_v19, 1 }
  0x30   : > { %v482_v25 = vsel %vm2369_vm1, %v383_v18, %v303_v7  ;;  %v809_v20 = vsel %vm2380_vm3, %v710_v22, %v644_v17  ;;  %v307_v40 = vunpack.c.h.bf16 %v2513_v21  ;;  %v386_v41 = vrot.slane %v306_v30, 1  ;;  %v2575_v17 = vld [vmem:[%s2362_s7 + $0x60] sm:$0xff]  }
  0x31   : > { %v548_v28 = vrot.slane %v482_v25, 2  ;;  %v483_v29 = vsel %vm2369_vm1, %v384_v24, %v304_v12  ;;  %v810_v15 = vsel %vm2380_vm3, %v711_v10, %v645_v4  ;;  %v842_v31 = vmul.f32 %v2408_v44, %v809_v20  ;;  %2242 = vmatmul.mubr.msk.bf16.gmra.mxu1 %vm886_vm0, %v2513_v21 }
  0x32   : > { %v646_v32 = vsel %vm2373_vm2, %v547_v26, %v481_v23  ;;  %v484_v33 = vsel %vm2369_vm1, %v385_v27, %v305_v19  ;;  %v843_v34 = vmul.f32 %v2408_v44, %v810_v15  ;;  %v549_v37 = vrot.slane %v483_v29, 2  ;;  %2245 = vmatprep.mubr.msk.bf16.mxu1 %vm886_vm0, %v276_v46 }
  0x33   : > { %2200 = vmatmul.mubr.msk.bf16.gmra.mxu0 %vm886_vm0, %v867_v8  ;;  %v647_v35 = vsel %vm2373_vm2, %v548_v28, %v482_v25  ;;  %v712_v36 = vrot.slane %v646_v32, 4  ;;  %v550_v39 = vrot.slane %v484_v33, 2  ;;  %v387_v53 = vrot.slane %v307_v40, 1 }
  0x34   : > { %v713_v38 = vrot.slane %v647_v35, 4  ;;  %v868_v42 = vpack.c.bf16 %v843_v34, %v842_v31  ;;  %v648_v45 = vsel %vm2373_vm2, %v549_v37, %v483_v29  ;;  %v485_v54 = vsel %vm2369_vm1, %v386_v41, %v306_v30 }
  0x35   : > { %v811_v43 = vsel %vm2380_vm3, %v712_v36, %v646_v32  ;;  %v649_v49 = vsel %vm2373_vm2, %v550_v39, %v484_v33  ;;  %v714_v50 = vrot.slane %v648_v45, 4  ;;  %v551_v56 = vrot.slane %v485_v54, 2 }
  0x36   : > { %v812_v47 = vsel %vm2380_vm3, %v713_v38, %v647_v35  ;;  %v844_v48 = vmul.f32 %v2408_v44, %v811_v43  ;;  %2203 = vmatprep.mubr.msk.bf16.mxu0 %vm886_vm0, %v868_v42  ;;  %v715_v52 = vrot.slane %v649_v49, 4  ;;  %v308_v57 = vunpack.c.l.bf16 %v276_v46  ;;  %v282_v42 = vld [vmem:[%s2362_s7 + $0x68] sm:$0xff]  }
  0x37   : > { %v845_v51 = vmul.f32 %v2408_v44, %v812_v47  ;;  %v813_v55 = vsel %vm2380_vm3, %v714_v50, %v648_v45  ;;  %v309_v58 = vunpack.c.h.bf16 %v276_v46  ;;  %v486_v0 = vsel %vm2369_vm1, %v387_v53, %v307_v40 }
  0x38   : > { %v814_v61 = vsel %vm2380_vm3, %v715_v52, %v649_v49  ;;  %v846_v62 = vmul.f32 %v2408_v44, %v813_v55  ;;  %v552_v1 = vrot.slane %v486_v0, 2  ;;  %v650_v2 = vsel %vm2373_vm2, %v551_v56, %v485_v54  ;;  %v284_v55 = vld [vmem:[%s2362_s7 + $0x70] sm:$0xff]  }
  0x39   : > { %v869_v60 = vpack.c.bf16 %v845_v51, %v844_v48  ;;  %v847_v63 = vmul.f32 %v2408_v44, %v814_v61  ;;  %v388_v3 = vrot.slane %v308_v57, 1  ;;  %v716_v5 = vrot.slane %v650_v2, 4  ;;  %2246 = vmatmul.mubr.msk.bf16.gmra.mxu1 %vm886_vm0, %v2557_v59 }
  0x3a   : > { %v389_v6 = vrot.slane %v309_v58, 1  ;;  %v310_v7 = vunpack.c.l.bf16 %v2557_v59  ;;  %v651_v9 = vsel %vm2373_vm2, %v552_v1, %v486_v0  ;;  %v311_v12 = vunpack.c.h.bf16 %v2557_v59  ;;  %2249 = vmatprep.mubr.msk.bf16.mxu1 %vm886_vm0, %v2575_v17 }
  0x3b   : > { %2204 = vmatmul.mubr.msk.bf16.gmra.mxu0 %vm886_vm0, %v869_v60  ;;  %v870_v8 = vpack.c.bf16 %v847_v63, %v846_v62  ;;  %v487_v11 = vsel %vm2369_vm1, %v388_v3, %v308_v57  ;;  %v717_v18 = vrot.slane %v651_v9, 4  ;;  %v815_v19 = vsel %vm2380_vm3, %v716_v5, %v650_v2 }
  0x3c   : > { %v488_v4 = vsel %vm2369_vm1, %v389_v6, %v309_v58  ;;  %v553_v22 = vrot.slane %v487_v11, 2  ;;  %v848_v23 = vmul.f32 %v2408_v44, %v815_v19  ;;  %v390_v10 = vrot.slane %v310_v7, 1 }
  0x3d   : > { %2207 = vmatprep.mubr.msk.bf16.mxu0 %vm886_vm0, %v870_v8  ;;  %v554_v24 = vrot.slane %v488_v4, 2  ;;  %v391_v25 = vrot.slane %v311_v12, 1  ;;  %v816_v26 = vsel %vm2380_vm3, %v717_v18, %v651_v9  ;;  %v312_v20 = vunpack.c.l.bf16 %v2575_v17  ;;  %v286_v8 = vld [vmem:[%s2362_s7 + $0x78] sm:$0xff]  }
  0x3e   : > { %v652_v27 = vsel %vm2373_vm2, %v553_v22, %v487_v11  ;;  %v849_v28 = vmul.f32 %v2408_v44, %v816_v26  ;;  %v489_v30 = vsel %vm2369_vm1, %v390_v10, %v310_v7  ;;  %v313_v33 = vunpack.c.h.bf16 %v2575_v17 }
  0x3f   : > { %v653_v21 = vsel %vm2373_vm2, %v554_v24, %v488_v4  ;;  %v718_v29 = vrot.slane %v652_v27, 4  ;;  %v490_v31 = vsel %vm2369_vm1, %v391_v25, %v311_v12  ;;  %v555_v32 = vrot.slane %v489_v30, 2 }
  0x40   : > { %v719_v15 = vrot.slane %v653_v21, 4  ;;  %v871_v34 = vpack.c.bf16 %v849_v28, %v848_v23  ;;  %v556_v36 = vrot.slane %v490_v31, 2  ;;  %v392_v37 = vrot.slane %v312_v20, 1 }
  0x41   : > { %v817_v35 = vsel %vm2380_vm3, %v718_v29, %v652_v27  ;;  %v654_v40 = vsel %vm2373_vm2, %v555_v32, %v489_v30  ;;  %v393_v41 = vrot.slane %v313_v33, 1  ;;  %v314_v54 = vunpack.c.l.bf16 %v282_v42  ;;  %2250 = vmatmul.mubr.msk.bf16.gmra.mxu1 %vm886_vm0, %v282_v42 }
  0x42   : > { %v818_v38 = vsel %vm2380_vm3, %v719_v15, %v653_v21  ;;  %v850_v39 = vmul.f32 %v2408_v44, %v817_v35  ;;  %v655_v45 = vsel %vm2373_vm2, %v556_v36, %v490_v31  ;;  %v720_v46 = vrot.slane %v654_v40, 4  ;;  %2253 = vmatprep.mubr.msk.bf16.mxu1 %vm886_vm0, %v284_v55 }
  0x43   : > { %2208 = vmatmul.mubr.msk.bf16.gmra.mxu0 %vm886_vm0, %v871_v34  ;;  %v851_v43 = vmul.f32 %v2408_v44, %v818_v38  ;;  %v491_v47 = vsel %vm2369_vm1, %v392_v37, %v312_v20  ;;  %v721_v48 = vrot.slane %v655_v45, 4  ;;  %v492_v49 = vsel %vm2369_vm1, %v393_v41, %v313_v33 }
  0x44   : > { %v557_v50 = vrot.slane %v491_v47, 2  ;;  %v819_v52 = vsel %vm2380_vm3, %v720_v46, %v654_v40  ;;  %v558_v53 = vrot.slane %v492_v49, 2  ;;  %v315_v60 = vunpack.c.h.bf16 %v282_v42 }
  0x45   : > { %v872_v51 = vpack.c.bf16 %v851_v43, %v850_v39  ;;  %v820_v56 = vsel %vm2380_vm3, %v721_v48, %v655_v45  ;;  %v852_v57 = vmul.f32 %v2408_v44, %v819_v52  ;;  %v394_v63 = vrot.slane %v314_v54, 1 }
  0x46   : > { %v656_v58 = vsel %vm2373_vm2, %v557_v50, %v491_v47  ;;  %v853_v61 = vmul.f32 %v2408_v44, %v820_v56  ;;  %v657_v62 = vsel %vm2373_vm2, %v558_v53, %v492_v49  ;;  %v395_v2 = vrot.slane %v315_v60, 1 }
  0x47   : > { %2211 = vmatprep.mubr.msk.bf16.mxu0 %vm886_vm0, %v872_v51  ;;  %v722_v0 = vrot.slane %v656_v58, 4  ;;  %v723_v1 = vrot.slane %v657_v62, 4  ;;  %v316_v3 = vunpack.c.l.bf16 %v284_v55  ;;  %v493_v59 = vsel %vm2369_vm1, %v394_v63, %v314_v54 }
  0x48   : > { %v873_v5 = vpack.c.bf16 %v853_v61, %v852_v57  ;;  %v317_v7 = vunpack.c.h.bf16 %v284_v55  ;;  %v494_v12 = vsel %vm2369_vm1, %v395_v2, %v315_v60  ;;  %v559_v18 = vrot.slane %v493_v59, 2 }
  0x49   : > { %v821_v6 = vsel %vm2380_vm3, %v722_v0, %v656_v58  ;;  %v822_v9 = vsel %vm2380_vm3, %v723_v1, %v657_v62  ;;  %v560_v4 = vrot.slane %v494_v12, 2  ;;  %v396_v22 = vrot.slane %v316_v3, 1  ;;  %2254 = vmatmul.mubr.msk.bf16.gmra.mxu1 %vm886_vm0, %v286_v8 }
  0x4a   : > { %v854_v11 = vmul.f32 %v2408_v44, %v821_v6  ;;  %v855_v19 = vmul.f32 %v2408_v44, %v822_v9  ;;  %v397_v23 = vrot.slane %v317_v7, 1  ;;  %v658_v24 = vsel %vm2373_vm2, %v559_v18, %v493_v59 }
  0x4b   : > { %2212 = vmatmul.mubr.msk.bf16.gmra.mxu0 %vm886_vm0, %v873_v5  ;;  %v318_v10 = vunpack.c.l.bf16 %v286_v8  ;;  %v319_v25 = vunpack.c.h.bf16 %v286_v8  ;;  %v659_v27 = vsel %vm2373_vm2, %v560_v4, %v494_v12  ;;  %v724_v20 = vrot.slane %v658_v24, 4 }
  0x4c   : > { %v874_v26 = vpack.c.bf16 %v855_v19, %v854_v11  ;;  %v495_v17 = vsel %vm2369_vm1, %v396_v22, %v316_v3  ;;  %v725_v28 = vrot.slane %v659_v27, 4  ;;  %v496_v21 = vsel %vm2369_vm1, %v397_v23, %v317_v7 }
  0x4d   : > { %v561_v29 = vrot.slane %v495_v17, 2  ;;  %v398_v30 = vrot.slane %v318_v10, 1  ;;  %v823_v15 = vsel %vm2380_vm3, %v724_v20, %v658_v24  ;;  %v562_v31 = vrot.slane %v496_v21, 2 }
  0x4e   : > { %2215 = vmatprep.mubr.msk.bf16.mxu0 %vm886_vm0, %v874_v26  ;;  %v399_v32 = vrot.slane %v319_v25, 1  ;;  %v824_v33 = vsel %vm2380_vm3, %v725_v28, %v659_v27  ;;  %v856_v34 = vmul.f32 %v2408_v44, %v823_v15  ;;  %v2720_v28 = vld [vmem:[%s3101_s5] sm:$0xff] }
  0x4f   : > { %v660_v35 = vsel %vm2373_vm2, %v561_v29, %v495_v17  ;;  %v497_v36 = vsel %vm2369_vm1, %v398_v30, %v318_v10  ;;  %v857_v37 = vmul.f32 %v2408_v44, %v824_v33  ;;  %v661_v38 = vsel %vm2373_vm2, %v562_v31, %v496_v21  ;;  %v2709_v10 = vld [vmem:[%s3100_s4] sm:$0xff] }
  0x50   : > { %v726_v39 = vrot.slane %v660_v35, 4  ;;  %v498_v40 = vsel %vm2369_vm1, %v399_v32, %v319_v25  ;;  %v727_v41 = vrot.slane %v661_v38, 4  ;;  %v563_v42 = vrot.slane %v497_v36, 2 }
  0x51   : > { %v564_v43 = vrot.slane %v498_v40, 2  ;;  %v875_v45 = vpack.c.bf16 %v857_v37, %v856_v34 }
  0x52   : > { %v825_v46 = vsel %vm2380_vm3, %v726_v39, %v660_v35  ;;  %v826_v47 = vsel %vm2380_vm3, %v727_v41, %v661_v38  ;;  %v662_v49 = vsel %vm2373_vm2, %v563_v42, %v497_v36 }
  0x53   : > { %v858_v48 = vmul.f32 %v2408_v44, %v825_v46  ;;  %v663_v50 = vsel %vm2373_vm2, %v564_v43, %v498_v40  ;;  %2216 = vmatmul.mubr.msk.bf16.gmra.mxu0 %vm886_vm0, %v875_v45  ;;  %v859_v51 = vmul.f32 %v2408_v44, %v826_v47  ;;  %v728_v52 = vrot.slane %v662_v49, 4 }
  0x54   : > { %v729_v53 = vrot.slane %v663_v50, 4 }
  0x55   : > { %v876_v54 = vpack.c.bf16 %v859_v51, %v858_v48  ;;  %v827_v55 = vsel %vm2380_vm3, %v728_v52, %v662_v49 }
  0x56   : > { %v828_v56 = vsel %vm2380_vm3, %v729_v53, %v663_v50  ;;  %v860_v57 = vmul.f32 %v2408_v44, %v827_v55 }
  0x57   : > { %v861_v58 = vmul.f32 %v2408_v44, %v828_v56  ;;  %2219 = vmatprep.mubr.msk.bf16.mxu0 %vm886_vm0, %v876_v54 }
  0x59   : > { %v877_v60 = vpack.c.bf16 %v861_v58, %v860_v57 }
  0x5b   : > { %2220 = vmatmul.mubr.msk.bf16.gmra.mxu0 %vm886_vm0, %v877_v60 }
  0xd1   : > { %v2227_v61 = vpop.f32.mrf.mxu1 }
  0xd3   : > { %v1814_v62 = vpop.f32.mrf.mxu1 }
  0xd5   : > { %v2688_v0 = vpop.f32.mrf.mxu1 }
  0xd7   : > { %v2690_v63 = vpop.f32.mrf.mxu1 }
  0xd9   : > { %v2692_v3 = vpop.f32.mrf.mxu1 }
  0xdb   : > { %v2696_v59 = vpop.f32.mrf.mxu1 }
  0xdd   : > { %v2700_v12 = vpop.f32.mrf.mxu1 }
  0xdf   : > { %v2722_v21 = vpop.f32.mrf.mxu1 }
  0xe0   : > { %v2193_v1 = vpop.f32.mrf.mxu0 }
  0xe1   : > { %v1130_v2 = vrot.slane %v2193_v1, 7  ;;  %v2736_v40 = vpop.f32.mrf.mxu1 }
  0xe2   : > { %v969_v5 = vpop.f32.mrf.mxu0 }
  0xe3   : > { %v1227_v6 = vsel %vm2369_vm1, %v1130_v2, %v2193_v1  ;;  %v1128_v44 = vrot.slane %v969_v5, 7  ;;  %v2749_v49 = vpop.f32.mrf.mxu1 }
  0xe4   : > { %v1291_v7 = vrot.slane %v1227_v6, 6  ;;  %v2194_v8 = vpop.f32.mrf.mxu0 }
  0xe5   : > { %v1225_v9 = vsel %vm2369_vm1, %v1128_v44, %v969_v5  ;;  %v1131_v11 = vrot.slane %v2194_v8, 7  ;;  %v2755_v58 = vpop.f32.mrf.mxu1 }
  0xe6   : > { %v1388_v18 = vsel %vm2373_vm2, %v1291_v7, %v1227_v6  ;;  %v1289_v19 = vrot.slane %v1225_v9, 6  ;;  %v972_v4 = vpop.f32.mrf.mxu0 }
  0xe7   : > { %v1452_v22 = vrot.slane %v1388_v18, 4  ;;  %v1228_v23 = vsel %vm2369_vm1, %v1131_v11, %v2194_v8  ;;  %v1129_v24 = vrot.slane %v972_v4, 7  ;;  %v2765_v8 = vpop.f32.mrf.mxu1 }
  0xe8   : > { %v1386_v25 = vsel %vm2373_vm2, %v1289_v19, %v1225_v9  ;;  %v1292_v26 = vrot.slane %v1228_v23, 6 }
  0xe9   : > { %v1450_v27 = vrot.slane %v1386_v25, 4  ;;  %v1226_v20 = vsel %vm2369_vm1, %v1129_v24, %v972_v4  ;;  %v1548_v17 = vsel %vm2380_vm3, %v1452_v22, %v1388_v18  ;;  %v2776_v24 = vpop.f32.mrf.mxu1 }
  0xea   : > { %v1389_v29 = vsel %vm2373_vm2, %v1292_v26, %v1228_v23  ;;  %v1290_v30 = vrot.slane %v1226_v20, 6  ;;  %v1581_v15 = vmul.f32 %v2709_v10, %v1548_v17 }
  0xeb   : > { %v1453_v31 = vrot.slane %v1389_v29, 4  ;;  %v1546_v32 = vsel %vm2380_vm3, %v1450_v27, %v1386_v25  ;;  %v2197_v35 = vpop.f32.mrf.mxu0 }
  0xec   : > { %v1387_v33 = vsel %vm2373_vm2, %v1290_v30, %v1226_v20  ;;  %v1614_v34 = vadd.f32 %v2720_v28, %v1581_v15  ;;  %v1579_v36 = vmul.f32 %v2709_v10, %v1546_v32  ;;  %v1134_v38 = vrot.slane %v2197_v35, 7 }
  0xed   : > { %v1451_v37 = vrot.slane %v1387_v33, 4  ;;  %v1549_v39 = vsel %vm2380_vm3, %v1453_v31, %v1389_v29  ;;  %v985_v43 = vpop.f32.mrf.mxu0  ;;  %v2785_v31 = vpop.f32.mrf.mxu1 }
  0xee   : > { %v1943_v41 = vadd.f32 %v2227_v61, %v1614_v34  ;;  %v1612_v42 = vadd.f32 %v2720_v28, %v1579_v36  ;;  %v1582_v45 = vmul.f32 %v2709_v10, %v1549_v39  ;;  %v1231_v46 = vsel %vm2369_vm1, %v1134_v38, %v2197_v35 }
  0xef   : > { %v1132_v47 = vrot.slane %v985_v43, 7  ;;  %v1547_v48 = vsel %vm2380_vm3, %v1451_v37, %v1387_v33  ;;  %v1295_v51 = vrot.slane %v1231_v46, 6  ;;  %v2198_v54 = vpop.f32.mrf.mxu0 }
  0xf0   : > { %v1975_v50 = vmax.f32 %v1943_v41, 0.0  ;;  %v1941_v52 = vadd.f32 %v1814_v62, %v1612_v42  ;;  %v1615_v53 = vadd.f32 %v2720_v28, %v1582_v45  ;;  %v1135_v56 = vrot.slane %v2198_v54, 7  ;;  %v2799_v42 = vpop.f32.mrf.mxu1 }
  0xf1   : > { %v1229_v55 = vsel %vm2369_vm1, %v1132_v47, %v985_v43  ;;  %v1580_v57 = vmul.f32 %v2709_v10, %v1547_v48  ;;  %v1392_v60 = vsel %vm2373_vm2, %v1295_v51, %v1231_v46  ;;  %v988_v2 = vpop.f32.mrf.mxu0 }
  0xf2   : > { %2008 = vst.msk [vmem:[%s2743_s17 + $0x10] sm:$0xff] %vm2005_vm4, %v1975_v50  ;;  %v1973_v61 = vmax.f32 %v1941_v52, 0.0  ;;  %v1293_v1 = vrot.slane %v1229_v55, 6  ;;  %v1944_v62 = vadd.f32 %v2688_v0, %v1615_v53  ;;  %v1456_v5 = vrot.slane %v1392_v60, 4 }
  0xf3   : > { %v1232_v6 = vsel %vm2369_vm1, %v1135_v56, %v2198_v54  ;;  %v1613_v44 = vadd.f32 %v2720_v28, %v1580_v57  ;;  %v1133_v7 = vrot.slane %v988_v2, 7  ;;  %v2201_v19 = vpop.f32.mrf.mxu0  ;;  %v2808_v54 = vpop.f32.mrf.mxu1 }
  0xf4   : > { %2006 = vst.msk [vmem:[%s2743_s17] sm:$0xff] %vm2005_vm4, %v1973_v61  ;;  %v1390_v9 = vsel %vm2373_vm2, %v1293_v1, %v1229_v55  ;;  %v1976_v11 = vmax.f32 %v1944_v62, 0.0  ;;  %v1296_v18 = vrot.slane %v1232_v6, 6  ;;  %v1552_v23 = vsel %vm2380_vm3, %v1456_v5, %v1392_v60 }
  0xf5   : > { %v1454_v0 = vrot.slane %v1390_v9, 4  ;;  %v1942_v4 = vadd.f32 %v2690_v63, %v1613_v44  ;;  %v1230_v22 = vsel %vm2369_vm1, %v1133_v7, %v988_v2  ;;  %v1585_v27 = vmul.f32 %v2709_v10, %v1552_v23  ;;  %v1001_v17 = vpop.f32.mrf.mxu0 }
  0xf6   : > { %2009 = vst.msk [vmem:[%s2743_s17 + $0x18] sm:$0xff] %vm2005_vm4, %v1976_v11  ;;  %v1393_v25 = vsel %vm2373_vm2, %v1296_v18, %v1232_v6  ;;  %v1294_v26 = vrot.slane %v1230_v22, 6  ;;  %v1138_v20 = vrot.slane %v2201_v19, 7  ;;  %v1136_v15 = vrot.slane %v1001_v17, 7 }
  0xf7   : > { %v1457_v63 = vrot.slane %v1393_v25, 4  ;;  %v1974_v29 = vmax.f32 %v1942_v4, 0.0  ;;  %v1550_v30 = vsel %vm2380_vm3, %v1454_v0, %v1390_v9  ;;  %v1618_v33 = vadd.f32 %v2720_v28, %v1585_v27  ;;  %v2202_v36 = vpop.f32.mrf.mxu0  ;;  %v2823_v9 = vpop.f32.mrf.mxu1 }
  0xf8   : > { %v1391_v32 = vsel %vm2373_vm2, %v1294_v26, %v1230_v22  ;;  %v1235_v34 = vsel %vm2369_vm1, %v1138_v20, %v2201_v19  ;;  %v1583_v35 = vmul.f32 %v2709_v10, %v1550_v30  ;;  %v1233_v39 = vsel %vm2369_vm1, %v1136_v15, %v1001_v17 }
  0xf9   : > { %2007 = vst.msk [vmem:[%s2743_s17 + $0x8] sm:$0xff] %vm2005_vm4, %v1974_v29  ;;  %v1455_v37 = vrot.slane %v1391_v32, 4  ;;  %v1299_v38 = vrot.slane %v1235_v34, 6  ;;  %v1553_v41 = vsel %vm2380_vm3, %v1457_v63, %v1393_v25  ;;  %v1947_v43 = vadd.f32 %v2692_v3, %v1618_v33  ;;  %v1004_v48 = vpop.f32.mrf.mxu0  ;;  %v2841_v33 = vpop.f32.mrf.mxu1 }
  0xfa   : > { %v1616_v45 = vadd.f32 %v2720_v28, %v1583_v35  ;;  %v1297_v46 = vrot.slane %v1233_v39, 6  ;;  %v1586_v47 = vmul.f32 %v2709_v10, %v1553_v41  ;;  %v1139_v51 = vrot.slane %v2202_v36, 7 }
  0xfb   : > { %v1396_v50 = vsel %vm2373_vm2, %v1299_v38, %v1235_v34  ;;  %v1551_v52 = vsel %vm2380_vm3, %v1455_v37, %v1391_v32  ;;  %v1137_v53 = vrot.slane %v1004_v48, 7  ;;  %v1979_v55 = vmax.f32 %v1947_v43, 0.0  ;;  %v2205_v60 = vpop.f32.mrf.mxu0 }
  0xfc   : > { %v1460_v56 = vrot.slane %v1396_v50, 4  ;;  %v1945_v3 = vadd.f32 %v2696_v59, %v1616_v45  ;;  %v1394_v57 = vsel %vm2373_vm2, %v1297_v46, %v1233_v39  ;;  %v1619_v1 = vadd.f32 %v2720_v28, %v1586_v47 }
  0xfd   : > { %v1458_v61 = vrot.slane %v1394_v57, 4  ;;  %v1236_v62 = vsel %vm2369_vm1, %v1139_v51, %v2202_v36  ;;  %v1584_v2 = vmul.f32 %v2709_v10, %v1551_v52  ;;  %2012 = vst.msk [vmem:[%s2743_s17 + $0x30] sm:$0xff] %vm2005_vm4, %v1979_v55  ;;  %v1234_v59 = vsel %vm2369_vm1, %v1137_v53, %v1004_v48  ;;  %v1017_v7 = vpop.f32.mrf.mxu0  ;;  %v2861_v53 = vpop.f32.mrf.mxu1 }
  0xfe   : > { %v1977_v5 = vmax.f32 %v1945_v3, 0.0  ;;  %v1300_v6 = vrot.slane %v1236_v62, 6  ;;  %v1556_v44 = vsel %vm2380_vm3, %v1460_v56, %v1396_v50  ;;  %v1948_v11 = vadd.f32 %v2700_v12, %v1619_v1 }
  0xff   : > { %v1617_v18 = vadd.f32 %v2720_v28, %v1584_v2  ;;  %v1298_v19 = vrot.slane %v1234_v59, 6  ;;  %v1589_v0 = vmul.f32 %v2709_v10, %v1556_v44  ;;  %v1142_v22 = vrot.slane %v2205_v60, 7  ;;  %v2206_v26 = vpop.f32.mrf.mxu0 }
 0x100   : > { %2010 = vst.msk [vmem:[%s2743_s17 + $0x20] sm:$0xff] %vm2005_vm4, %v1977_v5  ;;  %v1397_v4 = vsel %vm2373_vm2, %v1300_v6, %v1236_v62  ;;  %v1554_v23 = vsel %vm2380_vm3, %v1458_v61, %v1394_v57  ;;  %v1140_v25 = vrot.slane %v1017_v7, 7  ;;  %v1980_v27 = vmax.f32 %v1948_v11, 0.0 }
 0x101   : > { %v1461_v20 = vrot.slane %v1397_v4, 4  ;;  %v1946_v12 = vadd.f32 %v2722_v21, %v1617_v18  ;;  %v1395_v17 = vsel %vm2373_vm2, %v1298_v19, %v1234_v59  ;;  %v1622_v29 = vadd.f32 %v2720_v28, %v1589_v0  ;;  %v1020_v32 = vpop.f32.mrf.mxu0  ;;  %v2882_v0 = vpop.f32.mrf.mxu1 }
 0x102   : > { %v1459_v63 = vrot.slane %v1395_v17, 4  ;;  %v1239_v30 = vsel %vm2369_vm1, %v1142_v22, %v2205_v60  ;;  %v1587_v15 = vmul.f32 %v2709_v10, %v1554_v23  ;;  %2013 = vst.msk [vmem:[%s2743_s17 + $0x38] sm:$0xff] %vm2005_vm4, %v1980_v27  ;;  %v1237_v21 = vsel %vm2369_vm1, %v1140_v25, %v1017_v7 }
 0x103   : > { %v1978_v34 = vmax.f32 %v1946_v12, 0.0  ;;  %v1303_v35 = vrot.slane %v1239_v30, 6  ;;  %v1557_v36 = vsel %vm2380_vm3, %v1461_v20, %v1397_v4  ;;  %v1951_v37 = vadd.f32 %v2736_v40, %v1622_v29  ;;  %v2209_v48 = vpop.f32.mrf.mxu0 }
 0x104   : > { %v1620_v38 = vadd.f32 %v2720_v28, %v1587_v15  ;;  %v1301_v39 = vrot.slane %v1237_v21, 6  ;;  %v1590_v41 = vmul.f32 %v2709_v10, %v1557_v36  ;;  %v1143_v45 = vrot.slane %v2206_v26, 7 }
 0x105   : > { %2011 = vst.msk [vmem:[%s2743_s17 + $0x28] sm:$0xff] %vm2005_vm4, %v1978_v34  ;;  %v1400_v43 = vsel %vm2373_vm2, %v1303_v35, %v1239_v30  ;;  %v1555_v46 = vsel %vm2380_vm3, %v1459_v63, %v1395_v17  ;;  %v1141_v47 = vrot.slane %v1020_v32, 7  ;;  %v1983_v50 = vmax.f32 %v1951_v37, 0.0  ;;  %v1033_v60 = vpop.f32.mrf.mxu0 }
 0x106   : > { %v1464_v51 = vrot.slane %v1400_v43, 4  ;;  %v1949_v40 = vadd.f32 %v2749_v49, %v1620_v38  ;;  %v1398_v52 = vsel %vm2373_vm2, %v1301_v39, %v1237_v21  ;;  %v1623_v56 = vadd.f32 %v2720_v28, %v1590_v41  ;;  %v2900_v21 = vpop.f32.mrf.mxu1 }
 0x107   : > { %v1462_v55 = vrot.slane %v1398_v52, 4  ;;  %v1240_v3 = vsel %vm2369_vm1, %v1143_v45, %v2206_v26  ;;  %v1588_v57 = vmul.f32 %v2709_v10, %v1555_v46  ;;  %2016 = vst.msk [vmem:[%s2743_s17 + $0x50] sm:$0xff] %vm2005_vm4, %v1983_v50  ;;  %v1238_v49 = vsel %vm2369_vm1, %v1141_v47, %v1020_v32  ;;  %v2210_v44 = vpop.f32.mrf.mxu0 }
 0x108   : > { %v1981_v61 = vmax.f32 %v1949_v40, 0.0  ;;  %v1304_v1 = vrot.slane %v1240_v3, 6  ;;  %v1560_v62 = vsel %vm2380_vm3, %v1464_v51, %v1400_v43  ;;  %v1952_v2 = vadd.f32 %v2755_v58, %v1623_v56 }
 0x109   : > { %v1621_v5 = vadd.f32 %v2720_v28, %v1588_v57  ;;  %v1302_v6 = vrot.slane %v1238_v49, 6  ;;  %v1593_v59 = vmul.f32 %v2709_v10, %v1560_v62  ;;  %v1146_v11 = vrot.slane %v2209_v48, 7  ;;  %v1036_v25 = vpop.f32.mrf.mxu0 }
 0x10a   : > { %2014 = vst.msk [vmem:[%s2743_s17 + $0x40] sm:$0xff] %vm2005_vm4, %v1981_v61  ;;  %v1401_v7 = vsel %vm2373_vm2, %v1304_v1, %v1240_v3  ;;  %v1558_v18 = vsel %vm2380_vm3, %v1462_v55, %v1398_v52  ;;  %v1144_v19 = vrot.slane %v1033_v60, 7  ;;  %v1984_v58 = vmax.f32 %v1952_v2, 0.0  ;;  %v2921_v3 = vpop.f32.mrf.mxu1 }
 0x10b   : > { %v1465_v4 = vrot.slane %v1401_v7, 4  ;;  %v1950_v22 = vadd.f32 %v2765_v8, %v1621_v5  ;;  %v1399_v23 = vsel %vm2373_vm2, %v1302_v6, %v1238_v49  ;;  %v1626_v27 = vadd.f32 %v2720_v28, %v1593_v59  ;;  %v2213_v30 = vpop.f32.mrf.mxu0 }
 0x10c   : > { %v1463_v26 = vrot.slane %v1399_v23, 4  ;;  %v1243_v20 = vsel %vm2369_vm1, %v1146_v11, %v2209_v48  ;;  %v1591_v12 = vmul.f32 %v2709_v10, %v1558_v18  ;;  %2017 = vst.msk [vmem:[%s2743_s17 + $0x58] sm:$0xff] %vm2005_vm4, %v1984_v58  ;;  %v1241_v8 = vsel %vm2369_vm1, %v1144_v19, %v1033_v60 }
 0x10d   : > { %v1982_v17 = vmax.f32 %v1950_v22, 0.0  ;;  %v1307_v63 = vrot.slane %v1243_v20, 6  ;;  %v1561_v29 = vsel %vm2380_vm3, %v1465_v4, %v1401_v7  ;;  %v1955_v15 = vadd.f32 %v2776_v24, %v1626_v27  ;;  %v1049_v41 = vpop.f32.mrf.mxu0  ;;  %v2939_v4 = vpop.f32.mrf.mxu1 }
 0x10e   : > { %v1624_v32 = vadd.f32 %v2720_v28, %v1591_v12  ;;  %v1305_v34 = vrot.slane %v1241_v8, 6  ;;  %v1594_v35 = vmul.f32 %v2709_v10, %v1561_v29  ;;  %v1147_v37 = vrot.slane %v2210_v44, 7 }
 0x10f   : > { %2015 = vst.msk [vmem:[%s2743_s17 + $0x48] sm:$0xff] %vm2005_vm4, %v1982_v17  ;;  %v1404_v36 = vsel %vm2373_vm2, %v1307_v63, %v1243_v20  ;;  %v1559_v38 = vsel %vm2380_vm3, %v1463_v26, %v1399_v23  ;;  %v1145_v39 = vrot.slane %v1036_v25, 7  ;;  %v1987_v24 = vmax.f32 %v1955_v15, 0.0  ;;  %v2214_v40 = vpop.f32.mrf.mxu0 }
 0x110   : > { %v1468_v43 = vrot.slane %v1404_v36, 4  ;;  %v1953_v45 = vadd.f32 %v2785_v31, %v1624_v32  ;;  %v1402_v46 = vsel %vm2373_vm2, %v1305_v34, %v1241_v8  ;;  %v1627_v48 = vadd.f32 %v2720_v28, %v1594_v35 }
 0x111   : > { %v1466_v47 = vrot.slane %v1402_v46, 4  ;;  %v1244_v50 = vsel %vm2369_vm1, %v1147_v37, %v2210_v44  ;;  %v1592_v51 = vmul.f32 %v2709_v10, %v1559_v38  ;;  %2020 = vst.msk [vmem:[%s2743_s17 + $0x70] sm:$0xff] %vm2005_vm4, %v1987_v24  ;;  %v1242_v31 = vsel %vm2369_vm1, %v1145_v39, %v1036_v25  ;;  %v1052_v49 = vpop.f32.mrf.mxu0 }
 0x112   : > { %v1985_v52 = vmax.f32 %v1953_v45, 0.0  ;;  %v1308_v55 = vrot.slane %v1244_v50, 6  ;;  %v1564_v56 = vsel %vm2380_vm3, %v1468_v43, %v1404_v36  ;;  %v1956_v57 = vadd.f32 %v2799_v42, %v1627_v48  ;;  %v2959_v36 = vpop.f32.mrf.mxu1 }
 0x113   : > { %v1625_v60 = vadd.f32 %v2720_v28, %v1592_v51  ;;  %v1306_v61 = vrot.slane %v1242_v31, 6  ;;  %v1597_v1 = vmul.f32 %v2709_v10, %v1564_v56  ;;  %v1150_v2 = vrot.slane %v2213_v30, 7  ;;  %v2217_v26 = vpop.f32.mrf.mxu0 }
 0x114   : > { %2018 = vst.msk [vmem:[%s2743_s17 + $0x60] sm:$0xff] %vm2005_vm4, %v1985_v52  ;;  %v1405_v62 = vsel %vm2373_vm2, %v1308_v55, %v1244_v50  ;;  %v1562_v5 = vsel %vm2380_vm3, %v1466_v47, %v1402_v46  ;;  %v1148_v6 = vrot.slane %v1049_v41, 7  ;;  %v1988_v59 = vmax.f32 %v1956_v57, 0.0  ;;  %v2980_v57 = vpop.f32.mrf.mxu1 }
 0x115   : > { %v1469_v44 = vrot.slane %v1405_v62, 4  ;;  %v1954_v42 = vadd.f32 %v2808_v54, %v1625_v60  ;;  %v1403_v7 = vsel %vm2373_vm2, %v1306_v61, %v1242_v31  ;;  %v1630_v18 = vadd.f32 %v2720_v28, %v1597_v1  ;;  %v1065_v15 = vpop.f32.mrf.mxu0 }
 0x116   : > { %v1467_v11 = vrot.slane %v1403_v7, 4  ;;  %v1247_v19 = vsel %vm2369_vm1, %v1150_v2, %v2213_v30  ;;  %v1595_v58 = vmul.f32 %v2709_v10, %v1562_v5  ;;  %2021 = vst.msk [vmem:[%s2743_s17 + $0x78] sm:$0xff] %vm2005_vm4, %v1988_v59  ;;  %v1245_v54 = vsel %vm2369_vm1, %v1148_v6, %v1049_v41 }
 0x117   : > { %v1986_v22 = vmax.f32 %v1954_v42, 0.0  ;;  %v1311_v23 = vrot.slane %v1247_v19, 6  ;;  %v1565_v25 = vsel %vm2380_vm3, %v1469_v44, %v1405_v62  ;;  %v1959_v27 = vadd.f32 %v2823_v9, %v1630_v18  ;;  %v2218_v24 = vpop.f32.mrf.mxu0 }
 0x118   : > { %v1628_v20 = vadd.f32 %v2720_v28, %v1595_v58  ;;  %v1309_v12 = vrot.slane %v1245_v54, 6  ;;  %v1598_v17 = vmul.f32 %v2709_v10, %v1565_v25  ;;  %v1151_v8 = vrot.slane %v2214_v40, 7  ;;  %v1910_v58 = vpop.f32.mrf.mxu1 }
 0x119   : > { %2019 = vst.msk [vmem:[%s2743_s17 + $0x68] sm:$0xff] %vm2005_vm4, %v1986_v22  ;;  %v1408_v63 = vsel %vm2373_vm2, %v1311_v23, %v1247_v19  ;;  %v1563_v29 = vsel %vm2380_vm3, %v1467_v11, %v1403_v7  ;;  %v1149_v30 = vrot.slane %v1052_v49, 7  ;;  %v1991_v32 = vmax.f32 %v1959_v27, 0.0 }
 0x11a   : > { %v1472_v34 = vrot.slane %v1408_v63, 4  ;;  %v1957_v9 = vadd.f32 %v2841_v33, %v1628_v20  ;;  %v1406_v35 = vsel %vm2373_vm2, %v1309_v12, %v1245_v54  ;;  %v1631_v38 = vadd.f32 %v2720_v28, %v1598_v17 }
 0x11b   : > { %v1470_v37 = vrot.slane %v1406_v35, 4  ;;  %v1248_v39 = vsel %vm2369_vm1, %v1151_v8, %v2214_v40  ;;  %v1596_v41 = vmul.f32 %v2709_v10, %v1563_v29  ;;  %2024 = vst.msk [vmem:[%s2743_s17 + $0x90] sm:$0xff] %vm2005_vm4, %v1991_v32  ;;  %v1246_v33 = vsel %vm2369_vm1, %v1149_v30, %v1052_v49  ;;  %v1068_v40 = vpop.f32.mrf.mxu0 }
 0x11c   : > { %v1989_v43 = vmax.f32 %v1957_v9, 0.0  ;;  %v1312_v45 = vrot.slane %v1248_v39, 6  ;;  %v1568_v46 = vsel %vm2380_vm3, %v1472_v34, %v1408_v63  ;;  %v1960_v47 = vadd.f32 %v2861_v53, %v1631_v38  ;;  %v2252_v34 = vpop.f32.mrf.mxu1 }
 0x11d   : > { %v1629_v48 = vadd.f32 %v2720_v28, %v1596_v41  ;;  %v1310_v50 = vrot.slane %v1246_v33, 6  ;;  %v1601_v51 = vmul.f32 %v2709_v10, %v1568_v46  ;;  %v1154_v55 = vrot.slane %v2217_v26, 7  ;;  %v2221_v49 = vpop.f32.mrf.mxu0 }
 0x11e   : > { %2022 = vst.msk [vmem:[%s2743_s17 + $0x80] sm:$0xff] %vm2005_vm4, %v1989_v43  ;;  %v1409_v52 = vsel %vm2373_vm2, %v1312_v45, %v1248_v39  ;;  %v1566_v31 = vsel %vm2380_vm3, %v1470_v37, %v1406_v35  ;;  %v1152_v56 = vrot.slane %v1065_v15, 7  ;;  %v1992_v53 = vmax.f32 %v1960_v47, 0.0 }
 0x11f   : > { %v1473_v60 = vrot.slane %v1409_v52, 4  ;;  %v1958_v61 = vadd.f32 %v2882_v0, %v1629_v48  ;;  %v1407_v1 = vsel %vm2373_vm2, %v1310_v50, %v1246_v33  ;;  %v1634_v2 = vadd.f32 %v2720_v28, %v1601_v51  ;;  %v1081_v22 = vpop.f32.mrf.mxu0 }
 0x120   : > { %v1471_v62 = vrot.slane %v1407_v1, 4  ;;  %v1251_v5 = vsel %vm2369_vm1, %v1154_v55, %v2217_v26  ;;  %v1599_v6 = vmul.f32 %v2709_v10, %v1566_v31  ;;  %2025 = vst.msk [vmem:[%s2743_s17 + $0x98] sm:$0xff] %vm2005_vm4, %v1992_v53  ;;  %v1249_v0 = vsel %vm2369_vm1, %v1152_v56, %v1065_v15 }
 0x121   : > { %v1990_v59 = vmax.f32 %v1958_v61, 0.0  ;;  %v1315_v44 = vrot.slane %v1251_v5, 6  ;;  %v1569_v42 = vsel %vm2380_vm3, %v1473_v60, %v1409_v52  ;;  %v1963_v7 = vadd.f32 %v2900_v21, %v1634_v2  ;;  %v2222_v9 = vpop.f32.mrf.mxu0  ;;  %v1913_v52 = vpop.f32.mrf.mxu1 }
 0x122   : > { %v1632_v11 = vadd.f32 %v2720_v28, %v1599_v6  ;;  %v1313_v18 = vrot.slane %v1249_v0, 6  ;;  %v1602_v19 = vmul.f32 %v2709_v10, %v1569_v42  ;;  %v1155_v54 = vrot.slane %v2218_v24, 7 }
 0x123   : > { %2023 = vst.msk [vmem:[%s2743_s17 + $0x88] sm:$0xff] %vm2005_vm4, %v1990_v59  ;;  %v1412_v23 = vsel %vm2373_vm2, %v1315_v44, %v1251_v5  ;;  %v1567_v25 = vsel %vm2380_vm3, %v1471_v62, %v1407_v1  ;;  %v1153_v26 = vrot.slane %v1068_v40, 7  ;;  %v1995_v27 = vmax.f32 %v1963_v7, 0.0  ;;  %v1084_v55 = vpop.f32.mrf.mxu0  ;;  %v2255_v42 = vpop.f32.mrf.mxu1 }
 0x124   : > { %v1476_v21 = vrot.slane %v1412_v23, 4  ;;  %v1961_v20 = vadd.f32 %v2921_v3, %v1632_v11  ;;  %v1410_v12 = vsel %vm2373_vm2, %v1313_v18, %v1249_v0  ;;  %v1635_v63 = vadd.f32 %v2720_v28, %v1602_v19 }
 0x125   : > { %v1474_v17 = vrot.slane %v1410_v12, 4  ;;  %v1252_v8 = vsel %vm2369_vm1, %v1155_v54, %v2218_v24  ;;  %v1600_v29 = vmul.f32 %v2709_v10, %v1567_v25  ;;  %2028 = vst.msk [vmem:[%s2743_s17 + $0xb0] sm:$0xff] %vm2005_vm4, %v1995_v27  ;;  %v1250_v32 = vsel %vm2369_vm1, %v1153_v26, %v1068_v40  ;;  %v1926_v13 = vpop.f32.mrf.mxu1 }
 0x126   : > { %v1993_v30 = vmax.f32 %v1961_v20, 0.0  ;;  %v1316_v15 = vrot.slane %v1252_v8, 6  ;;  %v1572_v3 = vsel %vm2380_vm3, %v1476_v21, %v1412_v23  ;;  %v1964_v35 = vadd.f32 %v2939_v4, %v1635_v63 }
 0x127   : > { %v1633_v37 = vadd.f32 %v2720_v28, %v1600_v29  ;;  %v1314_v38 = vrot.slane %v1250_v32, 6  ;;  %v1605_v39 = vmul.f32 %v2709_v10, %v1572_v3  ;;  %v1158_v24 = vrot.slane %v2221_v49, 7  ;;  %v2256_v14 = vpop.f32.mrf.mxu1 }
 0x128   : > { %2026 = vst.msk [vmem:[%s2743_s17 + $0xa0] sm:$0xff] %vm2005_vm4, %v1993_v30  ;;  %v1413_v41 = vsel %vm2373_vm2, %v1316_v15, %v1252_v8  ;;  %v1570_v43 = vsel %vm2380_vm3, %v1474_v17, %v1410_v12  ;;  %v1156_v45 = vrot.slane %v1081_v22, 7  ;;  %v1996_v33 = vmax.f32 %v1964_v35, 0.0 }
 0x129   : > { %v1477_v46 = vrot.slane %v1413_v41, 4  ;;  %v1962_v4 = vadd.f32 %v2959_v36, %v1633_v37  ;;  %v1411_v47 = vsel %vm2373_vm2, %v1314_v38, %v1250_v32  ;;  %v1638_v50 = vadd.f32 %v2720_v28, %v1605_v39 }
 0x12a   : > { %v1475_v48 = vrot.slane %v1411_v47, 4  ;;  %v1255_v51 = vsel %vm2369_vm1, %v1158_v24, %v2221_v49  ;;  %v1603_v40 = vmul.f32 %v2709_v10, %v1570_v43  ;;  %2029 = vst.msk [vmem:[%s2743_s17 + $0xb8] sm:$0xff] %vm2005_vm4, %v1996_v33  ;;  %v1253_v36 = vsel %vm2369_vm1, %v1156_v45, %v1081_v22 }
 0x12b   : > { %v1994_v31 = vmax.f32 %v1962_v4, 0.0  ;;  %v1319_v56 = vrot.slane %v1255_v51, 6  ;;  %v1573_v53 = vsel %vm2380_vm3, %v1477_v46, %v1413_v41  ;;  %v1967_v60 = vadd.f32 %v2980_v57, %v1638_v50  ;;  %v1929_v4 = vpop.f32.mrf.mxu1 }
 0x12c   : > { %v1636_v61 = vadd.f32 %v2720_v28, %v1603_v40  ;;  %v1317_v1 = vrot.slane %v1253_v36, 6  ;;  %v1606_v49 = vmul.f32 %v2709_v10, %v1573_v53  ;;  %v1159_v2 = vrot.slane %v2222_v9, 7 }
 0x12d   : > { %2027 = vst.msk [vmem:[%s2743_s17 + $0xa8] sm:$0xff] %vm2005_vm4, %v1994_v31  ;;  %v1416_v62 = vsel %vm2373_vm2, %v1319_v56, %v1255_v51  ;;  %v1571_v5 = vsel %vm2380_vm3, %v1475_v48, %v1411_v47  ;;  %v1157_v6 = vrot.slane %v1084_v55, 7  ;;  %v1999_v59 = vmax.f32 %v1967_v60, 0.0 }
 0x12e   : > { %v1480_v44 = vrot.slane %v1416_v62, 4  ;;  %v1965_v0 = vadd.f32 %v1910_v58, %v1636_v61  ;;  %v1414_v57 = vsel %vm2373_vm2, %v1317_v1, %v1253_v36  ;;  %v1639_v11 = vadd.f32 %v2720_v28, %v1606_v49 }
 0x12f   : > { %v1478_v7 = vrot.slane %v1414_v57, 4  ;;  %v1256_v18 = vsel %vm2369_vm1, %v1159_v2, %v2222_v9  ;;  %v1604_v19 = vmul.f32 %v2709_v10, %v1571_v5  ;;  %2032 = vst.msk [vmem:[%s2743_s17 + $0xd0] sm:$0xff] %vm2005_vm4, %v1999_v59  ;;  %v1254_v58 = vsel %vm2369_vm1, %v1157_v6, %v1084_v55 }
 0x130   : > { %v1997_v22 = vmax.f32 %v1965_v0, 0.0  ;;  %v1320_v23 = vrot.slane %v1256_v18, 6  ;;  %v1576_v54 = vsel %vm2380_vm3, %v1480_v44, %v1416_v62  ;;  %v1968_v25 = vadd.f32 %v2252_v34, %v1639_v11 }
 0x131   : > { %v1637_v26 = vadd.f32 %v2720_v28, %v1604_v19  ;;  %v1318_v27 = vrot.slane %v1254_v58, 6  ;;  %v1609_v21 = vmul.f32 %v2709_v10, %v1576_v54  ;;  %v1574_v12 = vsel %vm2380_vm3, %v1478_v7, %v1414_v57 }
 0x132   : > { %2030 = vst.msk [vmem:[%s2743_s17 + $0xc0] sm:$0xff] %vm2005_vm4, %v1997_v22  ;;  %v1417_v20 = vsel %vm2373_vm2, %v1320_v23, %v1256_v18  ;;  %v2000_v17 = vmax.f32 %v1968_v25, 0.0  ;;  %v1607_v32 = vmul.f32 %v2709_v10, %v1574_v12 }
 0x133   : > { %v1481_v63 = vrot.slane %v1417_v20, 4  ;;  %v1966_v8 = vadd.f32 %v1913_v52, %v1637_v26  ;;  %v1415_v29 = vsel %vm2373_vm2, %v1318_v27, %v1254_v58  ;;  %v1642_v15 = vadd.f32 %v2720_v28, %v1609_v21 }
 0x134   : > { %v1479_v30 = vrot.slane %v1415_v29, 4  ;;  %2033 = vst.msk [vmem:[%s2743_s17 + $0xd8] sm:$0xff] %vm2005_vm4, %v2000_v17  ;;  %v1640_v35 = vadd.f32 %v2720_v28, %v1607_v32 }
 0x135   : > { %v1998_v3 = vmax.f32 %v1966_v8, 0.0  ;;  %v1577_v34 = vsel %vm2380_vm3, %v1481_v63, %v1417_v20  ;;  %v1971_v9 = vadd.f32 %v2255_v42, %v1642_v15 }
 0x136   : > { %v1610_v37 = vmul.f32 %v2709_v10, %v1577_v34  ;;  %v1575_v38 = vsel %vm2380_vm3, %v1479_v30, %v1415_v29  ;;  %v1969_v24 = vadd.f32 %v1926_v13, %v1640_v35 }
 0x137   : > { %2031 = vst.msk [vmem:[%s2743_s17 + $0xc8] sm:$0xff] %vm2005_vm4, %v1998_v3  ;;  %v1608_v39 = vmul.f32 %v2709_v10, %v1575_v38  ;;  %v2003_v41 = vmax.f32 %v1971_v9, 0.0 }
 0x138   : > { %v1643_v43 = vadd.f32 %v2720_v28, %v1610_v37  ;;  %v2001_v33 = vmax.f32 %v1969_v24, 0.0 }
 0x139   : > { %v1641_v45 = vadd.f32 %v2720_v28, %v1608_v39  ;;  %2036 = vst.msk [vmem:[%s2743_s17 + $0xf0] sm:$0xff] %vm2005_vm4, %v2003_v41 }
 0x13a   : > { %v1972_v46 = vadd.f32 %v2256_v14, %v1643_v43  ;;  %2034 = vst.msk [vmem:[%s2743_s17 + $0xe0] sm:$0xff] %vm2005_vm4, %v2001_v33 }
 0x13b   : > { %v1970_v47 = vadd.f32 %v1929_v4, %v1641_v45 }
 0x13c   : > { %v2004_v16 = vmax.f32 %v1972_v46, 0.0 }
 0x13d   : > { %v2002_v48 = vmax.f32 %v1970_v47, 0.0 }
 0x13e   : > { %2037 = vst.msk [vmem:[%s2743_s17 + $0xf8] sm:$0xff] %vm2005_vm4, %v2004_v16 }
 0x13f   : > { %2035 = vst.msk [vmem:[%s2743_s17 + $0xe8] sm:$0xff] %vm2005_vm4, %v2002_v48 }
 0x140 PF: > { %s16_s21 = sadd.s32 1, %s2305_s21  }
 0x141   : > { %p13_p4 = scmp.ge.s32.totalorder %s16_s21, 10  }
 0x143   :  { %15 = sbr.rel (!%p13_p4) target bundleno = 1 (0x1), region = 74 }

</bundles_post_ra>
